<compile_context>
chip_gen: v7x
topology: tpu7x:2x2x1
jax: 0.10.0
libtpu: 0.0.40
codegen_flags: <defaults>
</compile_context>

<pallas_src>
import functools
import math

import jax
import jax.numpy as jnp
from jax import lax
from jax.experimental import pallas as pl
from jax.experimental.pallas import tpu as pltpu


# ----------------------------------------------------------------------------
# Fully fused forward kernel (projections + attention + BN/ReLU + linear head)
# ----------------------------------------------------------------------------
def fused_forward_kernel(*refs, layer_cfgs):
    nl = len(layer_cfgs)
    x_ref, adj_ref = refs[0], refs[1]
    layer_refs = refs[2:2 + 4 * nl]
    wp_ref, bp_ref = refs[2 + 4 * nl], refs[3 + 4 * nl]
    o_ref = refs[4 + 4 * nl]

    # Edge mask / additive softmax bias: computed once, reused every layer/head.
    adj = adj_ref[...]
    mask = adj > 0.0
    bias = jnp.where(mask, jnp.float32(0.0), jnp.float32(-1e30))

    x = x_ref[...].astype(jnp.float32)

    for li, (heads, c, concat, relu) in enumerate(layer_cfgs):
        w_ref, b_ref, bns_ref, bnb_ref = layer_refs[4 * li:4 * li + 4]

        # Fused Q|K|V|skip projection: one lane-dense matmul per layer.
        # (1/sqrt(C) attention scale is pre-folded into the Q columns.)
        proj = jnp.dot(x, w_ref[...], preferred_element_type=jnp.float32) + b_ref[...]

        hc = heads * c
        head_outs = []
        for h in range(heads):                       # static unroll over heads
            q = proj[:, h * c:(h + 1) * c]
            k = proj[:, hc + h * c:hc + (h + 1) * c]
            v_h = proj[:, 2 * hc + h * c:2 * hc + (h + 1) * c]

            # scores[i, j] = <q_i, k_j>  (contract last dims, no transpose op)
            s = lax.dot_general(q, k, (((1,), (1,)), ((), ())),
                                preferred_element_type=jnp.float32) + bias
            m = jnp.max(s, axis=-1, keepdims=True)
            p = jnp.where(mask, jnp.exp(s - m), 0.0)     # isolated-node guard
            denom = jnp.sum(p, axis=-1, keepdims=True)
            inv = jnp.where(
                denom > 0.0,
                pl.reciprocal(jnp.maximum(denom, jnp.float32(1e-30)), approx=True),
                0.0)
            head_outs.append(
                jnp.dot(p * inv, v_h, preferred_element_type=jnp.float32))

        if concat:
            out = jnp.concatenate(head_outs, axis=-1) + proj[:, 3 * hc:4 * hc]
        else:
            acc = head_outs[0]
            for ho in head_outs[1:]:
                acc = acc + ho
            out = acc * (1.0 / float(heads)) + proj[:, 3 * hc:3 * hc + c]

        # BatchNorm1d (running stats, pre-reduced to scale/shift) + optional ReLU.
        y = out * bns_ref[...] + bnb_ref[...]
        if relu:
            y = jnp.maximum(y, 0.0)
        x = y
        # F.dropout(p, training=False) -> identity in inference mode.

    # post_mp linear head.
    o = jnp.dot(x, wp_ref[...], preferred_element_type=jnp.float32) + bp_ref[...]
    o_ref[...] = o.astype(o_ref.dtype)


# ----------------------------------------------------------------------------
# Wrapper: fuse/fold per-layer weights ONCE, then a single pallas_call
# ----------------------------------------------------------------------------
def prepare_fused_params(convs, bns, post, *, eps=1e-5):
    """Concatenate Q/K/V/skip weights per layer, fold the attention scale into
    Q and reduce BatchNorm to a single scale/shift pair (done once, offline)."""
    args = []
    cfgs = []
    nl = len(convs)
    for i, (p, bn) in enumerate(zip(convs, bns)):
        inv_sqrt_c = 1.0 / math.sqrt(p["C"])
        w_all = jnp.concatenate(
            [p["wq"] * inv_sqrt_c, p["wk"], p["wv"], p["ws"]], axis=1)
        b_all = jnp.concatenate(
            [p["bq"] * inv_sqrt_c, p["bk"], p["bv"], p["bs"]])[None, :]
        bn_scale = bn["gamma"] * jax.lax.rsqrt(bn["var"] + eps)
        bn_shift = bn["beta"] - bn["mean"] * bn_scale
        args += [w_all, b_all, bn_scale[None, :], bn_shift[None, :]]
        relu = i < nl - 1                             # last layer: BN only, no ReLU
        cfgs.append((p["heads"], p["C"], p["concat"], relu))
    w_post, b_post = post
    args += [w_post, b_post.reshape(1, -1)]
    return tuple(cfgs), args


def graph_transformer_forward(node_feature, adj, layer_cfgs, fused_args):
    n = node_feature.shape[0]
    kern = functools.partial(fused_forward_kernel, layer_cfgs=layer_cfgs)
    vmem = pl.BlockSpec(memory_space=pltpu.MemorySpace.VMEM)
    inputs = [node_feature, adj, *fused_args]
    return pl.pallas_call(
        kern,
        out_shape=jax.ShapeDtypeStruct((n, 1), jnp.float32),
        in_specs=[vmem] * len(inputs),
        out_specs=vmem,
    )(*inputs)


# ----------------------------------------------------------------------------
# Parameter init (stand-in for torch.manual_seed(22) initialisation)
# ----------------------------------------------------------------------------
def init_params(key, *, input_size=300, hidden_size=32, num_heads=2, num_layers=3):
    keys = iter(jax.random.split(key, 128))

    def lin_init(fan_in, fan_out):
        w = jax.random.normal(next(keys), (fan_in, fan_out), jnp.float32)
        w = w * (1.0 / jnp.sqrt(jnp.float32(fan_in)))
        b = 0.01 * jax.random.normal(next(keys), (fan_out,), jnp.float32)
        return w, b

    layer_dims = [(input_size, hidden_size, num_heads, True)]
    for _ in range(1, num_layers - 1):
        layer_dims.append((hidden_size * num_heads, hidden_size, num_heads, True))
    layer_dims.append((hidden_size * num_heads, hidden_size, 1, False))

    convs, bns = [], []
    for fin, c, h, concat in layer_dims:
        hc = h * c
        wq, bq = lin_init(fin, hc)
        wk, bk = lin_init(fin, hc)
        wv, bv = lin_init(fin, hc)
        ws, bs = lin_init(fin, hc if concat else c)
        convs.append(dict(wq=wq, bq=bq, wk=wk, bk=bk, wv=wv, bv=bv,
                          ws=ws, bs=bs, heads=h, C=c, concat=concat))
        bn_dim = hc if concat else c
        bns.append(dict(
            gamma=1.0 + 0.1 * jax.random.normal(next(keys), (bn_dim,), jnp.float32),
            beta=0.1 * jax.random.normal(next(keys), (bn_dim,), jnp.float32),
            mean=0.1 * jax.random.normal(next(keys), (bn_dim,), jnp.float32),
            var=1.0 + 0.1 * jnp.abs(jax.random.normal(next(keys), (bn_dim,), jnp.float32)),
        ))
    w_post, b_post = lin_init(hidden_size, 1)
    return convs, bns, (w_post, b_post)


# ----------------------------------------------------------------------------
# Main
# ----------------------------------------------------------------------------
if __name__ == "__main__":
    N_NODES = 16
    INPUT_SIZE = 300          # fixed in the PyTorch module
    HIDDEN = 32
    HEADS = 2
    LAYERS = 3

    key = jax.random.PRNGKey(0)
    x = jax.random.normal(key, (N_NODES, INPUT_SIZE), jnp.float32)

    # Deterministic edge_index (src row 0, dst row 1): ring + skip-3 edges.
    src = jnp.concatenate([jnp.arange(N_NODES), jnp.arange(N_NODES)])
    dst = jnp.concatenate([(jnp.arange(N_NODES) + 1) % N_NODES,
                           (jnp.arange(N_NODES) + 3) % N_NODES])
    edge_index = jnp.stack([src, dst]).astype(jnp.int32)   # [2, E]

    # Dense adjacency mask: adj[dst, src] = 1.0  (glue, plain JAX)
    adj = jnp.zeros((N_NODES, N_NODES), jnp.float32).at[
        edge_index[1], edge_index[0]].set(1.0)

    convs, bns, post = init_params(jax.random.PRNGKey(22),
                                   input_size=INPUT_SIZE, hidden_size=HIDDEN,
                                   num_heads=HEADS, num_layers=LAYERS)
    layer_cfgs, fused_args = prepare_fused_params(convs, bns, post)

    out = graph_transformer_forward(x, adj, layer_cfgs, fused_args)
    out = jax.block_until_ready(out)
    assert out.shape == (N_NODES, 1)
    assert bool(jnp.all(jnp.isfinite(out)))
    print("KERNEL_OK")
</pallas_src>

<mosaic_0001>
module attributes {stable_mosaic.version = 11 : i64} {
  func.func @fused_forward_kernel(%arg0: memref<16x300xf32, #tpu.memory_space<vmem>>, %arg1: memref<16x16xf32, #tpu.memory_space<vmem>>, %arg2: memref<300x256xf32, #tpu.memory_space<vmem>>, %arg3: memref<1x256xf32, #tpu.memory_space<vmem>>, %arg4: memref<1x64xf32, #tpu.memory_space<vmem>>, %arg5: memref<1x64xf32, #tpu.memory_space<vmem>>, %arg6: memref<64x256xf32, #tpu.memory_space<vmem>>, %arg7: memref<1x256xf32, #tpu.memory_space<vmem>>, %arg8: memref<1x64xf32, #tpu.memory_space<vmem>>, %arg9: memref<1x64xf32, #tpu.memory_space<vmem>>, %arg10: memref<64x128xf32, #tpu.memory_space<vmem>>, %arg11: memref<1x128xf32, #tpu.memory_space<vmem>>, %arg12: memref<1x32xf32, #tpu.memory_space<vmem>>, %arg13: memref<1x32xf32, #tpu.memory_space<vmem>>, %arg14: memref<32x1xf32, #tpu.memory_space<vmem>>, %arg15: memref<1x1xf32, #tpu.memory_space<vmem>>, %arg16: memref<16x1xf32, #tpu.memory_space<vmem>>) attributes {dimension_semantics = [], scalar_prefetch = 0 : i64, scratch_operands = 0 : i64, tpu.core_type = #tpu.core_type<tc>} {
    %c0 = arith.constant 0 : index
    %c0_0 = arith.constant 0 : index
    %0 = vector.load %arg1[%c0, %c0_0] : memref<16x16xf32, #tpu.memory_space<vmem>>, vector<16x16xf32>
    %cst = arith.constant 0.000000e+00 : f32
    %1 = vector.broadcast %cst : f32 to vector<16x16xf32>
    %2 = arith.cmpf ogt, %0, %1 : vector<16x16xf32>
    %cst_1 = arith.constant 0.000000e+00 : f32
    %cst_2 = arith.constant -1.000000e+30 : f32
    %3 = vector.broadcast %cst_1 : f32 to vector<16x16xf32>
    %4 = vector.broadcast %cst_2 : f32 to vector<16x16xf32>
    %5 = arith.select %2, %3, %4 : vector<16x16xi1>, vector<16x16xf32>
    %c0_3 = arith.constant 0 : index
    %c0_4 = arith.constant 0 : index
    %6 = vector.load %arg0[%c0_3, %c0_4] : memref<16x300xf32, #tpu.memory_space<vmem>>, vector<16x300xf32>
    %c0_5 = arith.constant 0 : index
    %c0_6 = arith.constant 0 : index
    %7 = vector.load %arg2[%c0_5, %c0_6] : memref<300x256xf32, #tpu.memory_space<vmem>>, vector<300x256xf32>
    %cst_7 = arith.constant dense<0.000000e+00> : vector<16x256xf32>
    %8 = tpu.matmul %6, %7, %cst_7 {dimension_numbers = #tpu.dot_dimension_numbers<[1], [0], [0], [1], [0, 0, 1, 1], [], []>} : vector<16x300xf32>, vector<300x256xf32>, vector<16x256xf32> -> vector<16x256xf32>
    %c0_8 = arith.constant 0 : index
    %c0_9 = arith.constant 0 : index
    %9 = vector.load %arg3[%c0_8, %c0_9] : memref<1x256xf32, #tpu.memory_space<vmem>>, vector<1x256xf32>
    %10 = vector.broadcast %9 : vector<1x256xf32> to vector<16x256xf32>
    %11 = arith.addf %8, %10 : vector<16x256xf32>
    %12 = vector.extract_strided_slice %11 {offsets = [0, 0], sizes = [16, 32], strides = [1, 1]} : vector<16x256xf32> to vector<16x32xf32>
    %13 = vector.extract_strided_slice %11 {offsets = [0, 64], sizes = [16, 32], strides = [1, 1]} : vector<16x256xf32> to vector<16x32xf32>
    %14 = vector.extract_strided_slice %11 {offsets = [0, 128], sizes = [16, 32], strides = [1, 1]} : vector<16x256xf32> to vector<16x32xf32>
    %cst_10 = arith.constant dense<0.000000e+00> : vector<16x16xf32>
    %15 = tpu.matmul %12, %13, %cst_10 {dimension_numbers = #tpu.dot_dimension_numbers<[1], [1], [0], [0], [0, 0, 1, 0], [], []>} : vector<16x32xf32>, vector<16x32xf32>, vector<16x16xf32> -> vector<16x16xf32>
    %16 = arith.addf %15, %5 : vector<16x16xf32>
    %cst_11 = arith.constant dense<0xFF800000> : vector<16xf32>
    %17 = vector.multi_reduction <maximumf>, %16, %cst_11 [1] : vector<16x16xf32> to vector<16xf32>
    %18 = vector.shape_cast %17 : vector<16xf32> to vector<16x1xf32>
    %19 = vector.broadcast %18 : vector<16x1xf32> to vector<16x16xf32>
    %20 = arith.subf %16, %19 : vector<16x16xf32>
    %21 = math.exp %20 : vector<16x16xf32>
    %cst_12 = arith.constant 0.000000e+00 : f32
    %22 = vector.broadcast %cst_12 : f32 to vector<16x16xf32>
    %23 = arith.select %2, %21, %22 : vector<16x16xi1>, vector<16x16xf32>
    %cst_13 = arith.constant dense<0.000000e+00> : vector<16xf32>
    %24 = vector.multi_reduction <add>, %23, %cst_13 [1] : vector<16x16xf32> to vector<16xf32>
    %25 = vector.shape_cast %24 : vector<16xf32> to vector<16x1xf32>
    %cst_14 = arith.constant 0.000000e+00 : f32
    %26 = vector.broadcast %cst_14 : f32 to vector<16x1xf32>
    %27 = arith.cmpf ogt, %25, %26 : vector<16x1xf32>
    %cst_15 = arith.constant 1.000000e-30 : f32
    %28 = vector.broadcast %cst_15 : f32 to vector<16x1xf32>
    %29 = arith.maximumf %25, %28 : vector<16x1xf32>
    %30 = tpu.reciprocal %29 {approx = true} : vector<16x1xf32> -> vector<16x1xf32>
    %cst_16 = arith.constant 0.000000e+00 : f32
    %31 = vector.broadcast %cst_16 : f32 to vector<16x1xf32>
    %32 = arith.select %27, %30, %31 : vector<16x1xi1>, vector<16x1xf32>
    %33 = vector.broadcast %32 : vector<16x1xf32> to vector<16x16xf32>
    %34 = arith.mulf %23, %33 : vector<16x16xf32>
    %cst_17 = arith.constant dense<0.000000e+00> : vector<16x32xf32>
    %35 = tpu.matmul %34, %14, %cst_17 {dimension_numbers = #tpu.dot_dimension_numbers<[1], [0], [0], [1], [0, 0, 1, 1], [], []>} : vector<16x16xf32>, vector<16x32xf32>, vector<16x32xf32> -> vector<16x32xf32>
    %36 = vector.extract_strided_slice %11 {offsets = [0, 32], sizes = [16, 32], strides = [1, 1]} : vector<16x256xf32> to vector<16x32xf32>
    %37 = vector.extract_strided_slice %11 {offsets = [0, 96], sizes = [16, 32], strides = [1, 1]} : vector<16x256xf32> to vector<16x32xf32>
    %38 = vector.extract_strided_slice %11 {offsets = [0, 160], sizes = [16, 32], strides = [1, 1]} : vector<16x256xf32> to vector<16x32xf32>
    %cst_18 = arith.constant dense<0.000000e+00> : vector<16x16xf32>
    %39 = tpu.matmul %36, %37, %cst_18 {dimension_numbers = #tpu.dot_dimension_numbers<[1], [1], [0], [0], [0, 0, 1, 0], [], []>} : vector<16x32xf32>, vector<16x32xf32>, vector<16x16xf32> -> vector<16x16xf32>
    %40 = arith.addf %39, %5 : vector<16x16xf32>
    %cst_19 = arith.constant dense<0xFF800000> : vector<16xf32>
    %41 = vector.multi_reduction <maximumf>, %40, %cst_19 [1] : vector<16x16xf32> to vector<16xf32>
    %42 = vector.shape_cast %41 : vector<16xf32> to vector<16x1xf32>
    %43 = vector.broadcast %42 : vector<16x1xf32> to vector<16x16xf32>
    %44 = arith.subf %40, %43 : vector<16x16xf32>
    %45 = math.exp %44 : vector<16x16xf32>
    %cst_20 = arith.constant 0.000000e+00 : f32
    %46 = vector.broadcast %cst_20 : f32 to vector<16x16xf32>
    %47 = arith.select %2, %45, %46 : vector<16x16xi1>, vector<16x16xf32>
    %cst_21 = arith.constant dense<0.000000e+00> : vector<16xf32>
    %48 = vector.multi_reduction <add>, %47, %cst_21 [1] : vector<16x16xf32> to vector<16xf32>
    %49 = vector.shape_cast %48 : vector<16xf32> to vector<16x1xf32>
    %cst_22 = arith.constant 0.000000e+00 : f32
    %50 = vector.broadcast %cst_22 : f32 to vector<16x1xf32>
    %51 = arith.cmpf ogt, %49, %50 : vector<16x1xf32>
    %cst_23 = arith.constant 1.000000e-30 : f32
    %52 = vector.broadcast %cst_23 : f32 to vector<16x1xf32>
    %53 = arith.maximumf %49, %52 : vector<16x1xf32>
    %54 = tpu.reciprocal %53 {approx = true} : vector<16x1xf32> -> vector<16x1xf32>
    %cst_24 = arith.constant 0.000000e+00 : f32
    %55 = vector.broadcast %cst_24 : f32 to vector<16x1xf32>
    %56 = arith.select %51, %54, %55 : vector<16x1xi1>, vector<16x1xf32>
    %57 = vector.broadcast %56 : vector<16x1xf32> to vector<16x16xf32>
    %58 = arith.mulf %47, %57 : vector<16x16xf32>
    %cst_25 = arith.constant dense<0.000000e+00> : vector<16x32xf32>
    %59 = tpu.matmul %58, %38, %cst_25 {dimension_numbers = #tpu.dot_dimension_numbers<[1], [0], [0], [1], [0, 0, 1, 1], [], []>} : vector<16x16xf32>, vector<16x32xf32>, vector<16x32xf32> -> vector<16x32xf32>
    %60 = tpu.concatenate %35, %59 in 1 : vector<16x32xf32>, vector<16x32xf32> -> vector<16x64xf32>
    %61 = vector.extract_strided_slice %11 {offsets = [0, 192], sizes = [16, 64], strides = [1, 1]} : vector<16x256xf32> to vector<16x64xf32>
    %62 = arith.addf %60, %61 : vector<16x64xf32>
    %c0_26 = arith.constant 0 : index
    %c0_27 = arith.constant 0 : index
    %63 = vector.load %arg4[%c0_26, %c0_27] : memref<1x64xf32, #tpu.memory_space<vmem>>, vector<1x64xf32>
    %64 = vector.broadcast %63 : vector<1x64xf32> to vector<16x64xf32>
    %65 = arith.mulf %62, %64 : vector<16x64xf32>
    %c0_28 = arith.constant 0 : index
    %c0_29 = arith.constant 0 : index
    %66 = vector.load %arg5[%c0_28, %c0_29] : memref<1x64xf32, #tpu.memory_space<vmem>>, vector<1x64xf32>
    %67 = vector.broadcast %66 : vector<1x64xf32> to vector<16x64xf32>
    %68 = arith.addf %65, %67 : vector<16x64xf32>
    %cst_30 = arith.constant 0.000000e+00 : f32
    %69 = vector.broadcast %cst_30 : f32 to vector<16x64xf32>
    %70 = arith.maximumf %68, %69 : vector<16x64xf32>
    %c0_31 = arith.constant 0 : index
    %c0_32 = arith.constant 0 : index
    %71 = vector.load %arg6[%c0_31, %c0_32] : memref<64x256xf32, #tpu.memory_space<vmem>>, vector<64x256xf32>
    %cst_33 = arith.constant dense<0.000000e+00> : vector<16x256xf32>
    %72 = tpu.matmul %70, %71, %cst_33 {dimension_numbers = #tpu.dot_dimension_numbers<[1], [0], [0], [1], [0, 0, 1, 1], [], []>} : vector<16x64xf32>, vector<64x256xf32>, vector<16x256xf32> -> vector<16x256xf32>
    %c0_34 = arith.constant 0 : index
    %c0_35 = arith.constant 0 : index
    %73 = vector.load %arg7[%c0_34, %c0_35] : memref<1x256xf32, #tpu.memory_space<vmem>>, vector<1x256xf32>
    %74 = vector.broadcast %73 : vector<1x256xf32> to vector<16x256xf32>
    %75 = arith.addf %72, %74 : vector<16x256xf32>
    %76 = vector.extract_strided_slice %75 {offsets = [0, 0], sizes = [16, 32], strides = [1, 1]} : vector<16x256xf32> to vector<16x32xf32>
    %77 = vector.extract_strided_slice %75 {offsets = [0, 64], sizes = [16, 32], strides = [1, 1]} : vector<16x256xf32> to vector<16x32xf32>
    %78 = vector.extract_strided_slice %75 {offsets = [0, 128], sizes = [16, 32], strides = [1, 1]} : vector<16x256xf32> to vector<16x32xf32>
    %cst_36 = arith.constant dense<0.000000e+00> : vector<16x16xf32>
    %79 = tpu.matmul %76, %77, %cst_36 {dimension_numbers = #tpu.dot_dimension_numbers<[1], [1], [0], [0], [0, 0, 1, 0], [], []>} : vector<16x32xf32>, vector<16x32xf32>, vector<16x16xf32> -> vector<16x16xf32>
    %80 = arith.addf %79, %5 : vector<16x16xf32>
    %cst_37 = arith.constant dense<0xFF800000> : vector<16xf32>
    %81 = vector.multi_reduction <maximumf>, %80, %cst_37 [1] : vector<16x16xf32> to vector<16xf32>
    %82 = vector.shape_cast %81 : vector<16xf32> to vector<16x1xf32>
    %83 = vector.broadcast %82 : vector<16x1xf32> to vector<16x16xf32>
    %84 = arith.subf %80, %83 : vector<16x16xf32>
    %85 = math.exp %84 : vector<16x16xf32>
    %cst_38 = arith.constant 0.000000e+00 : f32
    %86 = vector.broadcast %cst_38 : f32 to vector<16x16xf32>
    %87 = arith.select %2, %85, %86 : vector<16x16xi1>, vector<16x16xf32>
    %cst_39 = arith.constant dense<0.000000e+00> : vector<16xf32>
    %88 = vector.multi_reduction <add>, %87, %cst_39 [1] : vector<16x16xf32> to vector<16xf32>
    %89 = vector.shape_cast %88 : vector<16xf32> to vector<16x1xf32>
    %cst_40 = arith.constant 0.000000e+00 : f32
    %90 = vector.broadcast %cst_40 : f32 to vector<16x1xf32>
    %91 = arith.cmpf ogt, %89, %90 : vector<16x1xf32>
    %cst_41 = arith.constant 1.000000e-30 : f32
    %92 = vector.broadcast %cst_41 : f32 to vector<16x1xf32>
    %93 = arith.maximumf %89, %92 : vector<16x1xf32>
    %94 = tpu.reciprocal %93 {approx = true} : vector<16x1xf32> -> vector<16x1xf32>
    %cst_42 = arith.constant 0.000000e+00 : f32
    %95 = vector.broadcast %cst_42 : f32 to vector<16x1xf32>
    %96 = arith.select %91, %94, %95 : vector<16x1xi1>, vector<16x1xf32>
    %97 = vector.broadcast %96 : vector<16x1xf32> to vector<16x16xf32>
    %98 = arith.mulf %87, %97 : vector<16x16xf32>
    %cst_43 = arith.constant dense<0.000000e+00> : vector<16x32xf32>
    %99 = tpu.matmul %98, %78, %cst_43 {dimension_numbers = #tpu.dot_dimension_numbers<[1], [0], [0], [1], [0, 0, 1, 1], [], []>} : vector<16x16xf32>, vector<16x32xf32>, vector<16x32xf32> -> vector<16x32xf32>
    %100 = vector.extract_strided_slice %75 {offsets = [0, 32], sizes = [16, 32], strides = [1, 1]} : vector<16x256xf32> to vector<16x32xf32>
    %101 = vector.extract_strided_slice %75 {offsets = [0, 96], sizes = [16, 32], strides = [1, 1]} : vector<16x256xf32> to vector<16x32xf32>
    %102 = vector.extract_strided_slice %75 {offsets = [0, 160], sizes = [16, 32], strides = [1, 1]} : vector<16x256xf32> to vector<16x32xf32>
    %cst_44 = arith.constant dense<0.000000e+00> : vector<16x16xf32>
    %103 = tpu.matmul %100, %101, %cst_44 {dimension_numbers = #tpu.dot_dimension_numbers<[1], [1], [0], [0], [0, 0, 1, 0], [], []>} : vector<16x32xf32>, vector<16x32xf32>, vector<16x16xf32> -> vector<16x16xf32>
    %104 = arith.addf %103, %5 : vector<16x16xf32>
    %cst_45 = arith.constant dense<0xFF800000> : vector<16xf32>
    %105 = vector.multi_reduction <maximumf>, %104, %cst_45 [1] : vector<16x16xf32> to vector<16xf32>
    %106 = vector.shape_cast %105 : vector<16xf32> to vector<16x1xf32>
    %107 = vector.broadcast %106 : vector<16x1xf32> to vector<16x16xf32>
    %108 = arith.subf %104, %107 : vector<16x16xf32>
    %109 = math.exp %108 : vector<16x16xf32>
    %cst_46 = arith.constant 0.000000e+00 : f32
    %110 = vector.broadcast %cst_46 : f32 to vector<16x16xf32>
    %111 = arith.select %2, %109, %110 : vector<16x16xi1>, vector<16x16xf32>
    %cst_47 = arith.constant dense<0.000000e+00> : vector<16xf32>
    %112 = vector.multi_reduction <add>, %111, %cst_47 [1] : vector<16x16xf32> to vector<16xf32>
    %113 = vector.shape_cast %112 : vector<16xf32> to vector<16x1xf32>
    %cst_48 = arith.constant 0.000000e+00 : f32
    %114 = vector.broadcast %cst_48 : f32 to vector<16x1xf32>
    %115 = arith.cmpf ogt, %113, %114 : vector<16x1xf32>
    %cst_49 = arith.constant 1.000000e-30 : f32
    %116 = vector.broadcast %cst_49 : f32 to vector<16x1xf32>
    %117 = arith.maximumf %113, %116 : vector<16x1xf32>
    %118 = tpu.reciprocal %117 {approx = true} : vector<16x1xf32> -> vector<16x1xf32>
    %cst_50 = arith.constant 0.000000e+00 : f32
    %119 = vector.broadcast %cst_50 : f32 to vector<16x1xf32>
    %120 = arith.select %115, %118, %119 : vector<16x1xi1>, vector<16x1xf32>
    %121 = vector.broadcast %120 : vector<16x1xf32> to vector<16x16xf32>
    %122 = arith.mulf %111, %121 : vector<16x16xf32>
    %cst_51 = arith.constant dense<0.000000e+00> : vector<16x32xf32>
    %123 = tpu.matmul %122, %102, %cst_51 {dimension_numbers = #tpu.dot_dimension_numbers<[1], [0], [0], [1], [0, 0, 1, 1], [], []>} : vector<16x16xf32>, vector<16x32xf32>, vector<16x32xf32> -> vector<16x32xf32>
    %124 = tpu.concatenate %99, %123 in 1 : vector<16x32xf32>, vector<16x32xf32> -> vector<16x64xf32>
    %125 = vector.extract_strided_slice %75 {offsets = [0, 192], sizes = [16, 64], strides = [1, 1]} : vector<16x256xf32> to vector<16x64xf32>
    %126 = arith.addf %124, %125 : vector<16x64xf32>
    %c0_52 = arith.constant 0 : index
    %c0_53 = arith.constant 0 : index
    %127 = vector.load %arg8[%c0_52, %c0_53] : memref<1x64xf32, #tpu.memory_space<vmem>>, vector<1x64xf32>
    %128 = vector.broadcast %127 : vector<1x64xf32> to vector<16x64xf32>
    %129 = arith.mulf %126, %128 : vector<16x64xf32>
    %c0_54 = arith.constant 0 : index
    %c0_55 = arith.constant 0 : index
    %130 = vector.load %arg9[%c0_54, %c0_55] : memref<1x64xf32, #tpu.memory_space<vmem>>, vector<1x64xf32>
    %131 = vector.broadcast %130 : vector<1x64xf32> to vector<16x64xf32>
    %132 = arith.addf %129, %131 : vector<16x64xf32>
    %cst_56 = arith.constant 0.000000e+00 : f32
    %133 = vector.broadcast %cst_56 : f32 to vector<16x64xf32>
    %134 = arith.maximumf %132, %133 : vector<16x64xf32>
    %c0_57 = arith.constant 0 : index
    %c0_58 = arith.constant 0 : index
    %135 = vector.load %arg10[%c0_57, %c0_58] : memref<64x128xf32, #tpu.memory_space<vmem>>, vector<64x128xf32>
    %cst_59 = arith.constant dense<0.000000e+00> : vector<16x128xf32>
    %136 = tpu.matmul %134, %135, %cst_59 {dimension_numbers = #tpu.dot_dimension_numbers<[1], [0], [0], [1], [0, 0, 1, 1], [], []>} : vector<16x64xf32>, vector<64x128xf32>, vector<16x128xf32> -> vector<16x128xf32>
    %c0_60 = arith.constant 0 : index
    %c0_61 = arith.constant 0 : index
    %137 = vector.load %arg11[%c0_60, %c0_61] : memref<1x128xf32, #tpu.memory_space<vmem>>, vector<1x128xf32>
    %138 = vector.broadcast %137 : vector<1x128xf32> to vector<16x128xf32>
    %139 = arith.addf %136, %138 : vector<16x128xf32>
    %140 = vector.extract_strided_slice %139 {offsets = [0, 0], sizes = [16, 32], strides = [1, 1]} : vector<16x128xf32> to vector<16x32xf32>
    %141 = vector.extract_strided_slice %139 {offsets = [0, 32], sizes = [16, 32], strides = [1, 1]} : vector<16x128xf32> to vector<16x32xf32>
    %142 = vector.extract_strided_slice %139 {offsets = [0, 64], sizes = [16, 32], strides = [1, 1]} : vector<16x128xf32> to vector<16x32xf32>
    %cst_62 = arith.constant dense<0.000000e+00> : vector<16x16xf32>
    %143 = tpu.matmul %140, %141, %cst_62 {dimension_numbers = #tpu.dot_dimension_numbers<[1], [1], [0], [0], [0, 0, 1, 0], [], []>} : vector<16x32xf32>, vector<16x32xf32>, vector<16x16xf32> -> vector<16x16xf32>
    %144 = arith.addf %143, %5 : vector<16x16xf32>
    %cst_63 = arith.constant dense<0xFF800000> : vector<16xf32>
    %145 = vector.multi_reduction <maximumf>, %144, %cst_63 [1] : vector<16x16xf32> to vector<16xf32>
    %146 = vector.shape_cast %145 : vector<16xf32> to vector<16x1xf32>
    %147 = vector.broadcast %146 : vector<16x1xf32> to vector<16x16xf32>
    %148 = arith.subf %144, %147 : vector<16x16xf32>
    %149 = math.exp %148 : vector<16x16xf32>
    %cst_64 = arith.constant 0.000000e+00 : f32
    %150 = vector.broadcast %cst_64 : f32 to vector<16x16xf32>
    %151 = arith.select %2, %149, %150 : vector<16x16xi1>, vector<16x16xf32>
    %cst_65 = arith.constant dense<0.000000e+00> : vector<16xf32>
    %152 = vector.multi_reduction <add>, %151, %cst_65 [1] : vector<16x16xf32> to vector<16xf32>
    %153 = vector.shape_cast %152 : vector<16xf32> to vector<16x1xf32>
    %cst_66 = arith.constant 0.000000e+00 : f32
    %154 = vector.broadcast %cst_66 : f32 to vector<16x1xf32>
    %155 = arith.cmpf ogt, %153, %154 : vector<16x1xf32>
    %cst_67 = arith.constant 1.000000e-30 : f32
    %156 = vector.broadcast %cst_67 : f32 to vector<16x1xf32>
    %157 = arith.maximumf %153, %156 : vector<16x1xf32>
    %158 = tpu.reciprocal %157 {approx = true} : vector<16x1xf32> -> vector<16x1xf32>
    %cst_68 = arith.constant 0.000000e+00 : f32
    %159 = vector.broadcast %cst_68 : f32 to vector<16x1xf32>
    %160 = arith.select %155, %158, %159 : vector<16x1xi1>, vector<16x1xf32>
    %161 = vector.broadcast %160 : vector<16x1xf32> to vector<16x16xf32>
    %162 = arith.mulf %151, %161 : vector<16x16xf32>
    %cst_69 = arith.constant dense<0.000000e+00> : vector<16x32xf32>
    %163 = tpu.matmul %162, %142, %cst_69 {dimension_numbers = #tpu.dot_dimension_numbers<[1], [0], [0], [1], [0, 0, 1, 1], [], []>} : vector<16x16xf32>, vector<16x32xf32>, vector<16x32xf32> -> vector<16x32xf32>
    %cst_70 = arith.constant 1.000000e+00 : f32
    %164 = vector.broadcast %cst_70 : f32 to vector<16x32xf32>
    %165 = arith.mulf %163, %164 : vector<16x32xf32>
    %166 = vector.extract_strided_slice %139 {offsets = [0, 96], sizes = [16, 32], strides = [1, 1]} : vector<16x128xf32> to vector<16x32xf32>
    %167 = arith.addf %165, %166 : vector<16x32xf32>
    %c0_71 = arith.constant 0 : index
    %c0_72 = arith.constant 0 : index
    %168 = vector.load %arg12[%c0_71, %c0_72] : memref<1x32xf32, #tpu.memory_space<vmem>>, vector<1x32xf32>
    %169 = vector.broadcast %168 : vector<1x32xf32> to vector<16x32xf32>
    %170 = arith.mulf %167, %169 : vector<16x32xf32>
    %c0_73 = arith.constant 0 : index
    %c0_74 = arith.constant 0 : index
    %171 = vector.load %arg13[%c0_73, %c0_74] : memref<1x32xf32, #tpu.memory_space<vmem>>, vector<1x32xf32>
    %172 = vector.broadcast %171 : vector<1x32xf32> to vector<16x32xf32>
    %173 = arith.addf %170, %172 : vector<16x32xf32>
    %c0_75 = arith.constant 0 : index
    %c0_76 = arith.constant 0 : index
    %174 = vector.load %arg14[%c0_75, %c0_76] : memref<32x1xf32, #tpu.memory_space<vmem>>, vector<32x1xf32>
    %cst_77 = arith.constant dense<0.000000e+00> : vector<16x1xf32>
    %175 = tpu.matmul %173, %174, %cst_77 {dimension_numbers = #tpu.dot_dimension_numbers<[1], [0], [0], [1], [0, 0, 1, 1], [], []>} : vector<16x32xf32>, vector<32x1xf32>, vector<16x1xf32> -> vector<16x1xf32>
    %c0_78 = arith.constant 0 : index
    %c0_79 = arith.constant 0 : index
    %176 = vector.load %arg15[%c0_78, %c0_79] : memref<1x1xf32, #tpu.memory_space<vmem>>, vector<1x1xf32>
    %177 = vector.broadcast %176 : vector<1x1xf32> to vector<16x1xf32>
    %178 = arith.addf %175, %177 : vector<16x1xf32>
    %c0_80 = arith.constant 0 : index
    %c0_81 = arith.constant 0 : index
    %179 = vector.load %arg16[%c0_80, %c0_81] : memref<16x1xf32, #tpu.memory_space<vmem>>, vector<16x1xf32>
    tpu.vector_store %arg16[%c0_80, %c0_81], %178 {strides = array<i32>} : memref<16x1xf32, #tpu.memory_space<vmem>>, vector<16x1xf32>,
    return
  }
}

</mosaic_0001>

<bundles_post_ra>
// kernel: tpu_custom_call.1
= control target key start
LH: loop header
LB: loop body
LE: loop exit
PB: predicated region body
PF: predicated region fallthrough
CT: control target
= control target key end

     0   :  { %s2802_s0 = inlined_call_operand.hbm [shape: f32[16,300], index: 0, kind: input, shape index: {}]   ;;  %s2803_s1 = inlined_call_operand.hbm [shape: f32[16,16], index: 1, kind: input, shape index: {}]   ;;  %s2804_s2 = inlined_call_operand.hbm [shape: f32[300,256], index: 2, kind: input, shape index: {}]   ;;  %s2805_s3 = inlined_call_operand.vmem [shape: f32[1,256], index: 3, kind: input, shape index: {}]   ;;  %s2806_s4 = inlined_call_operand.vmem [shape: f32[1,64], index: 4, kind: input, shape index: {}]   ;;  %s2807_s5 = inlined_call_operand.vmem [shape: f32[1,64], index: 5, kind: input, shape index: {}]   ;;  %s2808_s6 = inlined_call_operand.hbm [shape: f32[64,256], index: 6, kind: input, shape index: {}]   ;;  %s2809_s7 = inlined_call_operand.vmem [shape: f32[1,256], index: 7, kind: input, shape index: {}]   ;;  %s2810_s8 = inlined_call_operand.vmem [shape: f32[1,64], index: 8, kind: input, shape index: {}]   ;;  %s2811_s9 = inlined_call_operand.vmem [shape: f32[1,64], index: 9, kind: input, shape index: {}]   ;;  %s2812_s10 = inlined_call_operand.vmem [shape: f32[64,128], index: 10, kind: input, shape index: {}]   ;;  %s2813_s11 = inlined_call_operand.vmem [shape: f32[1,128], index: 11, kind: input, shape index: {}]   ;;  %s2814_s12 = inlined_call_operand.vmem [shape: f32[1,32], index: 12, kind: input, shape index: {}]   ;;  %s2815_s13 = inlined_call_operand.vmem [shape: f32[1,32], index: 13, kind: input, shape index: {}]   ;;  %s2816_s14 = inlined_call_operand.vmem [shape: f32[32,1], index: 14, kind: input, shape index: {}]   ;;  %s2817_s15 = inlined_call_operand.<no memory space> [shape: f32[1,1], index: 15, kind: input, shape index: {}]   ;;  %s2818_s16 = inlined_call_operand.vmem [shape: f32[16,1], index: 16, kind: output, shape index: {}]  }
   0x1   :  { %2820 = sst [smem:[#allocation13_spill]] %s2802_s0  ;;  %v21_v0 = vstv %s2817_s15 }
   0x2   :  { %22 = vst [vmem:[#allocation2] sm:$0x1] %v21_v0 }
   0x3   :  { %23 = vsyncpa [#allocation4], 0 }
   0x4   :  { %24 = vsyncpa [#allocation6], 0 }
   0x5   :  { %25 = vsyncpa [#allocation9], 0  ;;  %s2386_s23 = smov [#allocation5]   ;;  %s2292_s27 = scalar_lea.hbm %s2803_s1, 256 }
   0x6   :  { %s43_s24 = sshll.u32 %s2386_s23, 4  ;;  %p2293_p0 = scmp.ne.s32.totalorder %s2803_s1, %s2292_s27  ;;  %s44_s24 = int_to_ptr.vmem [resolvable:$true] %s43_s24 }
   0x7   :  { %p2296_p1 = scmp.lt.u32.totalorder %s2292_s27, %s2803_s1 }
   0x9   :  { %p2298_p2 = pnand %p2296_p1, %p2293_p0 }
   0xb   :  { %2301 = shalt.err (!%p2298_p2)
}
   0xc   :  { %s2302_s15 = scalar_lea.vmem %s44_s24, 256  ;;  %p2307_p4 = scmp.lt.s32.totalorder %s44_s24, %s44_s24 }
   0xd   :  { %p2303_p3 = scmp.ne.s32.totalorder %s44_s24, %s2302_s15  ;;  %p2308_p5 = scmp.lt.s32.totalorder %s2302_s15, %s2302_s15 }
   0xf   :  { %p2309_p6 = por %p2308_p5, %p2307_p4 }
  0x11   :  { %p2310_p7 = pnand %p2309_p6, %p2303_p3 }
  0x13   :  { %2313 = shalt.err (!%p2310_p7)
}
  0x14   :  { %s2387_s17 = smov 128   ;;  %s2388_s18 = smov 8  }
  0x15   :  { %49 = dma.hbm_to_vmem [thread:$0]  %s2803_s1, 256, %s44_s24, [#allocation6], %s2387_s17, %s2387_s17, %s2388_s18  }
  0x16   :  { %s2389_s21 = smov [#allocation3]   ;;  %s2821_s26 = sld [smem:[#allocation13_spill]] }
  0x17   :  { %s31_s22 = sshll.u32 %s2389_s21, 4  ;;  %s32_s22 = int_to_ptr.vmem [resolvable:$true] %s31_s22 }
  0x1c   :  { %s2314_s27 = scalar_lea.hbm %s2821_s26, 768 }
  0x1d   :  { %p2315_p8 = scmp.ne.s32.totalorder %s2821_s26, %s2314_s27  ;;  %p2318_p9 = scmp.lt.u32.totalorder %s2314_s27, %s2821_s26 }
  0x1f   :  { %p2320_p10 = pnand %p2318_p9, %p2315_p8 }
  0x21   :  { %2323 = shalt.err (!%p2320_p10)
}
  0x22   :  { %s2324_s15 = scalar_lea.vmem %s32_s22, 768  ;;  %p2329_p12 = scmp.lt.s32.totalorder %s32_s22, %s32_s22 }
  0x23   :  { %p2325_p11 = scmp.ne.s32.totalorder %s32_s22, %s2324_s15  ;;  %p2330_p13 = scmp.lt.s32.totalorder %s2324_s15, %s2324_s15 }
  0x25   :  { %p2331_p0 = por %p2330_p13, %p2329_p12 }
  0x27   :  { %p2332_p1 = pnand %p2331_p0, %p2325_p11 }
  0x29   :  { %2335 = shalt.err (!%p2332_p1)
}
  0x2a   :  { %s2390_s1 = smov 384   ;;  %s2391_s24 = smov 24  }
  0x2b   :  { %37 = dma.hbm_to_vmem [thread:$0]  %s2821_s26, 768, %s32_s22, [#allocation4], %s2390_s1, %s2390_s1, %s2391_s24  }
  0x2c   :  { %s2392_s19 = smov [#allocation7]   ;;  %s2336_s25 = scalar_lea.hbm %s2804_s2, 9728 }
  0x2d   :  { %s55_s20 = sshll.u32 %s2392_s19, 4  ;;  %p2337_p2 = scmp.ne.s32.totalorder %s2804_s2, %s2336_s25  ;;  %s56_s20 = int_to_ptr.vmem [resolvable:$true] %s55_s20 }
  0x2e   :  { %p2340_p3 = scmp.lt.u32.totalorder %s2336_s25, %s2804_s2 }
  0x30   :  { %p2342_p4 = pnand %p2340_p3, %p2337_p2 }
  0x32   :  { %2345 = shalt.err (!%p2342_p4)
}
  0x33   :  { %s2346_s0 = scalar_lea.vmem %s56_s20, 9728  ;;  %p2351_p6 = scmp.lt.s32.totalorder %s56_s20, %s56_s20 }
  0x34   :  { %p2347_p5 = scmp.ne.s32.totalorder %s56_s20, %s2346_s0  ;;  %p2352_p7 = scmp.lt.s32.totalorder %s2346_s0, %s2346_s0 }
  0x36   :  { %p2353_p8 = por %p2352_p7, %p2351_p6 }
  0x38   :  { %p2354_p9 = pnand %p2353_p8, %p2347_p5 }
  0x3a   :  { %2357 = shalt.err (!%p2354_p9)
}
  0x3b   :  { %s2393_s22 = smov 256   ;;  %s2394_s26 = smov 16  }
  0x3c   :  { %61 = dma.hbm_to_vmem [thread:$0]  %s2804_s2, 9728, %s56_s20, [#allocation6], %s2393_s22, %s2393_s22, %s2394_s26  }
  0x3d   :  { %s2395_s24 = smov [#allocation8]   ;;  %s2358_s21 = scalar_lea.hbm %s2808_s6, 2048 }
  0x3e   :  { %s73_s17 = sshll.u32 %s2395_s24, 4  ;;  %p2359_p10 = scmp.ne.s32.totalorder %s2808_s6, %s2358_s21  ;;  %s74_s17 = int_to_ptr.vmem [resolvable:$true] %s73_s17 }
  0x3f   :  { %p2362_p11 = scmp.lt.u32.totalorder %s2358_s21, %s2808_s6 }
  0x41   :  { %p2364_p12 = pnand %p2362_p11, %p2359_p10 }
  0x43   :  { %2367 = shalt.err (!%p2364_p12)
}
  0x44   :  { %s2368_s29 = scalar_lea.vmem %s74_s17, 2048  ;;  %p2373_p0 = scmp.lt.s32.totalorder %s74_s17, %s74_s17 }
  0x45   :  { %p2369_p13 = scmp.ne.s32.totalorder %s74_s17, %s2368_s29  ;;  %p2374_p1 = scmp.lt.s32.totalorder %s2368_s29, %s2368_s29 }
  0x47   :  { %p2375_p2 = por %p2374_p1, %p2373_p0 }
  0x49   :  { %p2376_p3 = pnand %p2375_p2, %p2369_p13 }
  0x4b   :  { %2379 = shalt.err (!%p2376_p3)
}
  0x4c   :  { %79 = dma.hbm_to_vmem [thread:$0]  %s2808_s6, 2048, %s74_s17, [#allocation9], %s2393_s22, %s2393_s22, %s2394_s26  }
  0x4d   :  { %2380 = dma.done.wait [#allocation4], 768  }
  0x4e   :  { %2381 = vsyncadd [#allocation4], 4294966528 }
  0x4f   :  { %2382 = dma.done.wait [#allocation6], 9984  }
  0x50   :  { %2383 = vsyncadd [#allocation6], 4294957312 }
  0x51   :  { %2384 = dma.done.wait [#allocation9], 2048  }
  0x52   :  { %2385 = vsyncadd [#allocation9], 4294965248  ;;  %v123_v1 = vld [vmem:[#allocation7 + $0x8] sm:$0xff]  ;;  %v125_v2 = vld [vmem:[#allocation7 + $0x18] sm:$0xff]  ;;  %vm217_vm0 = vcmask 1043456   ;;  %vm2396_vm1 = vmmov 1  }
  0x53   :  { %v122_v3 = vld [vmem:[#allocation7] sm:$0xff]  ;;  %v2020_v4 = vpack.c.bf16 %v125_v2, %v123_v1  ;;  %v124_v5 = vld [vmem:[#allocation7 + $0x10] sm:$0xff]  ;;  %v127_v6 = vld [vmem:[#allocation7 + $0x28] sm:$0xff]  ;;  %vm210_vm3 = vcmask 359424   ;;  %vm384_vm4 = vcmask 261120   ;;  %s2398_s0 = smov 64  }
  0x54   :  { %v129_v7 = vld [vmem:[#allocation7 + $0x38] sm:$0xff]  ;;  %v2022_v8 = vpack.c.bf16 %v124_v5, %v122_v3  ;;  %v126_v10 = vld [vmem:[#allocation7 + $0x20] sm:$0xff]  ;;  %v128_v11 = vld [vmem:[#allocation7 + $0x30] sm:$0xff]  ;;  %vm468_vm8 = vcmask 130048   ;;  %s2401_s22 = smov 96   ;;  %vm856_vm13 = vcmask 523264  }
  0x55   :  { %v2024_v9 = vpack.c.bf16 %v129_v7, %v127_v6  ;;  %v131_v12 = vld [vmem:[#allocation7 + $0x48] sm:$0xff]  ;;  %2021 = vmatprep.subr.bf16.mxu0 %v2020_v4  ;;  %v133_v13 = vld [vmem:[#allocation7 + $0x58] sm:$0xff]  ;;  %v2026_v14 = vpack.c.bf16 %v128_v11, %v126_v10  ;;  %v130_v16 = vld [vmem:[#allocation7 + $0x40] sm:$0xff] }
  0x56   :  { %2023 = vmatpush1.bf16.msra.mxu0 %v2022_v8  ;;  %v2028_v15 = vpack.c.bf16 %v133_v13, %v131_v12  ;;  %v132_v17 = vld [vmem:[#allocation7 + $0x50] sm:$0xff]  ;;  %v135_v18 = vld [vmem:[#allocation7 + $0x68] sm:$0xff]  ;;  %v137_v19 = vld [vmem:[#allocation7 + $0x78] sm:$0xff] }
  0x57   :  { %2025 = vmatprep.subr.bf16.mxu0 %v2024_v9  ;;  %v2030_v20 = vpack.c.bf16 %v132_v17, %v130_v16  ;;  %v2032_v21 = vpack.c.bf16 %v137_v19, %v135_v18  ;;  %v134_v22 = vld [vmem:[#allocation7 + $0x60] sm:$0xff]  ;;  %v136_v23 = vld [vmem:[#allocation7 + $0x70] sm:$0xff]  ;;  %v139_v24 = vld [vmem:[#allocation7 + $0x88] sm:$0xff] }
  0x58   :  { %v141_v25 = vld [vmem:[#allocation7 + $0x98] sm:$0xff]  ;;  %v2034_v26 = vpack.c.bf16 %v136_v23, %v134_v22  ;;  %v138_v28 = vld [vmem:[#allocation7 + $0x80] sm:$0xff]  ;;  %v140_v29 = vld [vmem:[#allocation7 + $0x90] sm:$0xff] }
  0x59   :  { %v2036_v27 = vpack.c.bf16 %v141_v25, %v139_v24  ;;  %v143_v30 = vld [vmem:[#allocation7 + $0xa8] sm:$0xff]  ;;  %v145_v31 = vld [vmem:[#allocation7 + $0xb8] sm:$0xff]  ;;  %v2038_v32 = vpack.c.bf16 %v140_v29, %v138_v28  ;;  %v142_v34 = vld [vmem:[#allocation7 + $0xa0] sm:$0xff] }
  0x5a   :  { %2027 = vmatpush1.bf16.msra.mxu0 %v2026_v14  ;;  %v2040_v33 = vpack.c.bf16 %v145_v31, %v143_v30  ;;  %v144_v35 = vld [vmem:[#allocation7 + $0xb0] sm:$0xff]  ;;  %v147_v36 = vld [vmem:[#allocation7 + $0xc8] sm:$0xff]  ;;  %v149_v37 = vld [vmem:[#allocation7 + $0xd8] sm:$0xff] }
  0x5b   :  { %2029 = vmatprep.subr.bf16.mxu0 %v2028_v15  ;;  %v2042_v38 = vpack.c.bf16 %v144_v35, %v142_v34  ;;  %v2044_v39 = vpack.c.bf16 %v149_v37, %v147_v36  ;;  %v146_v40 = vld [vmem:[#allocation7 + $0xc0] sm:$0xff]  ;;  %v148_v41 = vld [vmem:[#allocation7 + $0xd0] sm:$0xff]  ;;  %v117_v42 = vld [vmem:[#allocation3 + $0x8] sm:$0xff] }
  0x5c   :  { %v151_v43 = vld [vmem:[#allocation7 + $0xe8] sm:$0xff]  ;;  %v153_v44 = vld [vmem:[#allocation7 + $0xf8] sm:$0xff]  ;;  %288 = vmatprep.mubr.f32.mxu0 %v117_v42  ;;  %v2046_v45 = vpack.c.bf16 %v148_v41, %v146_v40  ;;  %v150_v47 = vld [vmem:[#allocation7 + $0xe0] sm:$0xff] }
  0x5d   :  { %v2048_v46 = vpack.c.bf16 %v153_v44, %v151_v43  ;;  %v152_v48 = vld [vmem:[#allocation7 + $0xf0] sm:$0xff]  ;;  %v155_v49 = vld [vmem:[#allocation7 + $0x108] sm:$0xff]  ;;  %v157_v50 = vld [vmem:[#allocation7 + $0x118] sm:$0xff] }
  0x5e   :  { %2031 = vmatpush1.bf16.msra.mxu0 %v2030_v20  ;;  %v2050_v51 = vpack.c.bf16 %v152_v48, %v150_v47  ;;  %v2052_v52 = vpack.c.bf16 %v157_v50, %v155_v49  ;;  %v154_v53 = vld [vmem:[#allocation7 + $0x100] sm:$0xff]  ;;  %v156_v54 = vld [vmem:[#allocation7 + $0x110] sm:$0xff]  ;;  %v159_v55 = vld [vmem:[#allocation7 + $0x128] sm:$0xff] }
  0x5f   :  { %2033 = vmatprep.subr.bf16.mxu0 %v2032_v21  ;;  %v161_v56 = vld [vmem:[#allocation7 + $0x138] sm:$0xff]  ;;  %v2054_v57 = vpack.c.bf16 %v156_v54, %v154_v53  ;;  %v158_v59 = vld [vmem:[#allocation7 + $0x120] sm:$0xff]  ;;  %v160_v60 = vld [vmem:[#allocation7 + $0x130] sm:$0xff] }
  0x60   :  { %v2056_v58 = vpack.c.bf16 %v161_v56, %v159_v55  ;;  %v163_v61 = vld [vmem:[#allocation7 + $0x148] sm:$0xff]  ;;  %v165_v62 = vld [vmem:[#allocation7 + $0x158] sm:$0xff]  ;;  %v2058_v63 = vpack.c.bf16 %v160_v60, %v158_v59  ;;  %v162_v1 = vld [vmem:[#allocation7 + $0x140] sm:$0xff]  ;;  %v2397_v55 = vmov 0.0  }
  0x61   :  { %v2060_v0 = vpack.c.bf16 %v165_v62, %v163_v61  ;;  %v164_v2 = vld [vmem:[#allocation7 + $0x150] sm:$0xff]  ;;  %v167_v3 = vld [vmem:[#allocation7 + $0x168] sm:$0xff]  ;;  %v169_v4 = vld [vmem:[#allocation7 + $0x178] sm:$0xff] }
  0x62   :  { %2035 = vmatpush1.bf16.msra.mxu0 %v2034_v26  ;;  %v2062_v5 = vpack.c.bf16 %v164_v2, %v162_v1  ;;  %v2064_v6 = vpack.c.bf16 %v169_v4, %v167_v3  ;;  %v166_v7 = vld [vmem:[#allocation7 + $0x160] sm:$0xff]  ;;  %v168_v8 = vld [vmem:[#allocation7 + $0x170] sm:$0xff]  ;;  %v171_v9 = vld [vmem:[#allocation7 + $0x188] sm:$0xff] }
  0x63   :  { %2037 = vmatprep.subr.bf16.mxu0 %v2036_v27  ;;  %v173_v10 = vld [vmem:[#allocation7 + $0x198] sm:$0xff]  ;;  %v2066_v11 = vpack.c.bf16 %v168_v8, %v166_v7  ;;  %v170_v13 = vld [vmem:[#allocation7 + $0x180] sm:$0xff]  ;;  %v172_v14 = vld [vmem:[#allocation7 + $0x190] sm:$0xff] }
  0x64   :  { %v2068_v12 = vpack.c.bf16 %v173_v10, %v171_v9  ;;  %v175_v15 = vld [vmem:[#allocation7 + $0x1a8] sm:$0xff]  ;;  %v177_v16 = vld [vmem:[#allocation7 + $0x1b8] sm:$0xff]  ;;  %v2070_v17 = vpack.c.bf16 %v172_v14, %v170_v13  ;;  %v174_v19 = vld [vmem:[#allocation7 + $0x1a0] sm:$0xff] }
  0x65   :  { %v2072_v18 = vpack.c.bf16 %v177_v16, %v175_v15  ;;  %v176_v20 = vld [vmem:[#allocation7 + $0x1b0] sm:$0xff]  ;;  %v179_v21 = vld [vmem:[#allocation7 + $0x1c8] sm:$0xff]  ;;  %v181_v22 = vld [vmem:[#allocation7 + $0x1d8] sm:$0xff] }
  0x66   :  { %2039 = vmatpush1.bf16.msra.mxu0 %v2038_v32  ;;  %v2074_v23 = vpack.c.bf16 %v176_v20, %v174_v19  ;;  %v2076_v24 = vpack.c.bf16 %v181_v22, %v179_v21  ;;  %v178_v25 = vld [vmem:[#allocation7 + $0x1c0] sm:$0xff]  ;;  %v180_v26 = vld [vmem:[#allocation7 + $0x1d0] sm:$0xff]  ;;  %v183_v27 = vld [vmem:[#allocation7 + $0x1e8] sm:$0xff] }
  0x67   :  { %2041 = vmatprep.subr.bf16.mxu0 %v2040_v33  ;;  %v185_v28 = vld [vmem:[#allocation7 + $0x1f8] sm:$0xff]  ;;  %v2078_v29 = vpack.c.bf16 %v180_v26, %v178_v25  ;;  %v182_v31 = vld [vmem:[#allocation7 + $0x1e0] sm:$0xff]  ;;  %v184_v32 = vld [vmem:[#allocation7 + $0x1f0] sm:$0xff] }
  0x68   :  { %v2080_v30 = vpack.c.bf16 %v185_v28, %v183_v27  ;;  %v187_v33 = vld [vmem:[#allocation7 + $0x208] sm:$0xff]  ;;  %v189_v34 = vld [vmem:[#allocation7 + $0x218] sm:$0xff]  ;;  %v2082_v35 = vpack.c.bf16 %v184_v32, %v182_v31  ;;  %v186_v37 = vld [vmem:[#allocation7 + $0x200] sm:$0xff] }
  0x69   :  { %v2084_v36 = vpack.c.bf16 %v189_v34, %v187_v33  ;;  %v193_v40 = vld [vmem:[#allocation7 + $0x238] sm:$0xff]  ;;  %v116_v41 = vld [vmem:[#allocation3] sm:$0xff]  ;;  %v195_v47 = vld [vmem:[#allocation7 + $0x248] sm:$0xff] }
  0x6a   :  { %2043 = vmatpush1.bf16.msra.mxu0 %v2042_v38  ;;  %v188_v38 = vld [vmem:[#allocation7 + $0x210] sm:$0xff]  ;;  %v190_v44 = vld [vmem:[#allocation7 + $0x220] sm:$0xff]  ;;  %v197_v48 = vld [vmem:[#allocation7 + $0x258] sm:$0xf] }
  0x6b   :  { %2045 = vmatprep.subr.bf16.mxu0 %v2044_v39  ;;  %v191_v39 = vld [vmem:[#allocation7 + $0x228] sm:$0xff]  ;;  %v2086_v42 = vpack.c.bf16 %v188_v38, %v186_v37  ;;  %v119_v50 = vld [vmem:[#allocation3 + $0x18] sm:$0xff]  ;;  %v196_v53 = vld [vmem:[#allocation7 + $0x250] sm:$0xf] }
  0x6c   :  { %v2088_v43 = vpack.c.bf16 %v193_v40, %v191_v39  ;;  %vm2093_vm2 = vmpackc.low %vm217_vm0, %vm2396_vm1  ;;  %v118_v56 = vld [vmem:[#allocation3 + $0x10] sm:$0xff]  ;;  %v198_v61 = vld [vmem:[%s2805_s3] sm:$0x3]  ;;  %s2400_s3 = smov 32  }
  0x6d   :  { %vm2561_vm5 = vmpackc.low %vm384_vm4, %vm384_vm4  ;;  %v2574_v16 = vld [vmem:[#allocation5 + $0x8] sm:$0xff] }
  0x6e   :  { %2047 = vmatpush1.bf16.msra.mxu0 %v2046_v45  ;;  %v192_v45 = vld [vmem:[#allocation7 + $0x230] sm:$0xff]  ;;  %vm113_vm6 = vcmp.gt.f32.partialorder %v2574_v16, 0.0 }
  0x6f   :  { %2049 = vmatprep.subr.bf16.mxu0 %v2048_v46  ;;  %v120_v46 = vld [vmem:[#allocation3 + $0x20] sm:$0xff]  ;;  %v2090_v49 = vpack.c.bf16 %v192_v45, %v190_v44 }
  0x72   :  { %2051 = vmatpush1.bf16.msra.mxu0 %v2050_v51  ;;  %v2092_v51 = vpack.c.bf16 %v197_v48, %v195_v47 }
  0x73   :  { %2053 = vmatprep.subr.bf16.mxu0 %v2052_v52  ;;  %v194_v52 = vld [vmem:[#allocation7 + $0x240] sm:$0xff] }
  0x74   :  { %v2095_v54 = vpack.c.bf16 %v196_v53, %v194_v52 }
  0x76   :  { %2055 = vmatpush1.bf16.msra.mxu0 %v2054_v57  ;;  %v121_v57 = vld [vmem:[#allocation3 + $0x28] sm:$0xff] }
  0x77   :  { %2057 = vmatprep.subr.bf16.mxu0 %v2056_v58  ;;  %v200_v58 = vlaneseq }
  0x79   :  { %v2540_v59 = vshrl.u32 %v200_v58, 7 }
  0x7a   :  { %2059 = vmatpush1.bf16.msra.mxu0 %v2058_v63 }
  0x7b   :  { %2061 = vmatprep.subr.bf16.mxu0 %v2060_v0  ;;  %v202_v60 = vsub.s32 0, %v2540_v59 }
  0x7d   :  { %v203_v62 = vrot.slane %v198_v61, %v202_v60 }
  0x7e   :  { %2063 = vmatpush1.bf16.msra.mxu0 %v2062_v5 }
  0x7f   :  { %2065 = vmatprep.subr.bf16.mxu0 %v2064_v6  ;;  %v206_v6 = vsub.s32 1, %v2540_v59 }
  0x81   :  { %v207_v7 = vrot.slane %v198_v61, %v206_v6 }
  0x82   :  { %2067 = vmatpush1.bf16.msra.mxu0 %v2066_v11 }
  0x83   :  { %2069 = vmatprep.subr.bf16.mxu0 %v2068_v12 }
  0x86   :  { %2071 = vmatpush1.bf16.msra.mxu0 %v2070_v17  ;;  %v2576_v17 = vld [vmem:[#allocation5] sm:$0xff] }
  0x87   :  { %2073 = vmatprep.subr.bf16.mxu0 %v2072_v18  ;;  %vm112_vm7 = vcmp.gt.f32.partialorder %v2576_v17, 0.0  ;;  %v2399_v18 = vmov -1e+30  }
  0x88   :  { %v2582_v19 = vsel %vm113_vm6, 0.0, %v2399_v18  ;;  %v2586_v20 = vsel %vm112_vm7, 0.0, %v2399_v18 }
  0x8a   :  { %2075 = vmatpush1.bf16.msra.mxu0 %v2074_v23 }
  0x8b   :  { %2077 = vmatprep.subr.bf16.mxu0 %v2076_v24 }
  0x8e   :  { %2079 = vmatpush1.bf16.msra.mxu0 %v2078_v29 }
  0x8f   :  { %2081 = vmatprep.subr.bf16.mxu0 %v2080_v30 }
  0x92   :  { %2083 = vmatpush1.bf16.msra.mxu0 %v2082_v35 }
  0x93   :  { %2085 = vmatprep.subr.bf16.mxu0 %v2084_v36 }
  0x95   :  { %289 = vmatmul.mubr.f32.vlgmr.msra.gmra.mrb[0].mxu0 %v116_v41 }
  0x96   :  { %2087 = vmatpush1.bf16.msra.mxu0 %v2086_v42  ;;  %294 = vmatprep.mubr.f32.mxu0 %v120_v46 }
  0x97   :  { %2089 = vmatprep.subr.bf16.mxu0 %v2088_v43 }
  0x99   :  { %295 = vmatmul.mubr.f32.gmra.mrb[2].mxu0 %v119_v50 }
  0x9a   :  { %2091 = vmatpush1.bf16.msra.mxu0 %v2090_v49  ;;  %365 = vmatprep.mubr.f32.mxu0 %v2397_v55 }
  0x9b   :  { %2094 = vmatprep.subr.msk.bf16.mxu0 %vm2093_vm2, %v2092_v51 }
  0x9e   :  { %2097 = vmatpush1.bf16.msk.msra.mxu0 %vm2093_vm2, %v2095_v54 }
  0xa1   :  { %1818 = vmatmul.mubr.msk.f32.vlgmr.msra.gmra.mrb[0].mxu0 %vm210_vm3, %v118_v56 }
  0xa2   :  { %371 = vmatprep.mubr.f32.mxu0 %v2397_v55 }
  0xa5   :  { %1819 = vmatmul.mubr.msk.f32.gmra.mrb[2].mxu0 %vm210_vm3, %v121_v57 }
 0x174   :  { %v367_v63 = vpop.f32.mrb[0].mxu0 }
 0x175   :  { %v2548_v0 = vadd.f32 %v367_v63, %v203_v62  ;;  %v369_v1 = vpop.f32.mrb[1].mxu0 }
 0x176   :  { %v2565_v13 = vadd.f32 %v369_v1, %v207_v7 }
 0x177   :  { %1924 = vmatprep.mubr.msk.f32.mxu1 %vm384_vm4, %v2548_v0 }
 0x178   :  { %v373_v2 = vpop.f32.mrb[2].mxu0 }
 0x179   :  { %v2190_v3 = vadd.f32 %v373_v2, %v203_v62  ;;  %v375_v4 = vpop.f32.mrb[3].mxu0 }
 0x17a   :  { %v2557_v9 = vadd.f32 %v375_v4, %v207_v7 }
 0x17b   :  { %v2212_v5 = vpack.i.bf16 %v2190_v3, %v2548_v0 }
 0x17c   :  { %v2104_v15 = vpack.c.bf16 %v2557_v9, %v2565_v13 }
 0x17d   :  { %2213 = vrot.lane.b32.xlu0 %v2212_v5, %s2398_s0 }
 0x1ef   :  { %v2214_v8 = vpop.permute.xlu0 %2213 }
 0x1f0   :  { %v2216_v10 = vunpack.i.h.bf16 %v2214_v8  ;;  %v2215_v11 = vunpack.i.l.bf16 %v2214_v8 }
 0x1f2   :  { %v2098_v14 = vpack.c.bf16 %v2216_v10, %v2215_v11 }
 0x1f4   :  { %2100 = vmatprep.subr.msk.bf16.mxu1 %vm2561_vm5, %v2098_v14 }
 0x1f5   :  { %2103 = vmatpush3.bf16.xpose.msk.msra.mxu1 %vm2561_vm5, %v2098_v14 }
 0x1f6   :  { %2105 = vmatprep.subr.bf16.mxu1 %v2104_v15 }
 0x1fc   :  { %1925 = vmatmul.mubr.msk.f32.vlgmr.msra.gmra.mrb[0].mxu1 %vm384_vm4, %v2190_v3 }
 0x1fd   :  { %2107 = vmatpush3.bf16.msra.mxu1 %v2104_v15 }
 0x2cf   :  { %v1926_v21 = vpop.f32.mrb[0].mxu1 }
 0x2d0   :  { %v465_v22 = vadd.f32 %v1926_v21, %v2582_v19  ;;  %v459_v23 = vpop.f32.mrb[1].mxu1 }
 0x2d1   :  { %v460_v24 = vadd.f32 %v459_v23, %v2586_v20 }
 0x2d2   :  { %v472_v25 = vsel %vm468_vm8, %v465_v22, -inf }
 0x2d3   :  { %473 = vmax.xlane.f32.xlu1 %v472_v25  ;;  %v469_v26 = vsel %vm468_vm8, %v460_v24, -inf }
 0x2d4   :  { %470 = vmax.xlane.f32.xlu0 %v469_v26 }
 0x2e4   :  { %2218 = vrot.lane.b32.xlu1 %v2212_v5, %s2400_s3 }
 0x360   :  { %v474_v27 = vpop.xlane.xlu1 %473 }
 0x361   :  { %v476_v28 = vsub.f32 %v465_v22, %v474_v27  ;;  %v471_v29 = vpop.xlane.xlu0 %470  ;;  %v2222_v22 = vpack.i.bf16 %v2557_v9, %v2565_v13 }
 0x362   :  { %v475_v30 = vsub.f32 %v460_v24, %v471_v29 }
 0x363   :  { %v479_v31 = vmul.f32 1.442695, %v476_v28 }
 0x364   :  { %v477_v32 = vmul.f32 1.442695, %v475_v30  ;;  %v2219_v33 = vpop.permute.xlu1 %2218 }
 0x365   :  { %2252 = vpow2.f32 %v479_v31  ;;  %v2221_v34 = vunpack.i.h.bf16 %v2219_v33  ;;  %v2220_v35 = vunpack.i.l.bf16 %v2219_v33 }
 0x366   :  { %2254 = vpow2.f32 %v477_v32 }
 0x367   :  { %v2108_v36 = vpack.c.bf16 %v2221_v34, %v2220_v35 }
 0x369   :  { %2110 = vmatprep.subr.msk.bf16.mxu1 %vm2561_vm5, %v2108_v36 }
 0x36f   :  { %v2253_v37 = vpop.eup %2252 }
 0x370   :  { %v2255_v38 = vpop.eup %2254  ;;  %v482_v39 = vsel %vm113_vm6, %v2253_v37, 0.0  ;;  %v829_v37 = vld [vmem:[#allocation8 + $0x8] sm:$0xff] }
 0x371   :  { %v486_v40 = vsel %vm468_vm8, %v482_v39, 0.0  ;;  %v481_v41 = vsel %vm112_vm7, %v2255_v38, 0.0  ;;  %v831_v38 = vld [vmem:[#allocation8 + $0x18] sm:$0xff] }
 0x372   :  { %487 = vadd.xlane.f32.xlu1 %v486_v40  ;;  %v483_v42 = vsel %vm468_vm8, %v481_v41, 0.0  ;;  %v2118_v40 = vpack.c.bf16 %v831_v38, %v829_v37 }
 0x376   :  { %484 = vadd.xlane.f32.xlu1 %v483_v42 }
 0x387   :  { %580 = vrot.lane.b32.xlu1 %v2548_v0, %s2401_s22 }
 0x38b   :  { %582 = vrot.lane.b32.xlu1 %v2190_v3, %s2401_s22 }
 0x3ff   :  { %v488_v43 = vpop.xlane.xlu1 %487 }
 0x400   :  { %v492_v44 = vmax.f32 %v488_v43, 1e-30  ;;  %vm490_vm9 = vcmp.gt.f32.partialorder %v488_v43, 0.0  ;;  %v833_v43 = vld [vmem:[#allocation8 + $0x28] sm:$0xff] }
 0x402   :  { %2256 = vrcp.f32 %v492_v44  ;;  %v835_v44 = vld [vmem:[#allocation8 + $0x38] sm:$0xff] }
 0x403   :  { %v485_v45 = vpop.xlane.xlu1 %484 }
 0x404   :  { %v491_v46 = vmax.f32 %v485_v45, 1e-30  ;;  %vm489_vm10 = vcmp.gt.f32.partialorder %v485_v45, 0.0  ;;  %v2122_v45 = vpack.c.bf16 %v835_v44, %v833_v43 }
 0x406   :  { %2258 = vrcp.f32 %v491_v46  ;;  %v832_v46 = vld [vmem:[#allocation8 + $0x20] sm:$0xff] }
 0x407   :  { %v581_v53 = vpop.permute.xlu1 %580 }
 0x40b   :  { %v583_v54 = vpop.permute.xlu1 %582 }
 0x40c   :  { %v2257_v47 = vpop.eup %2256 }
 0x40d   :  { %v496_v49 = vsel %vm490_vm9, %v2257_v47, 0.0  ;;  %v834_v47 = vld [vmem:[#allocation8 + $0x30] sm:$0xff] }
 0x40e   :  { %v498_v52 = vmul.f32 %v496_v49, %v482_v39  ;;  %v828_v39 = vld [vmem:[#allocation8] sm:$0xff]  ;;  %v837_v49 = vld [vmem:[#allocation8 + $0x48] sm:$0xff] }
 0x410   :  { %v2259_v48 = vpop.eup %2258 }
 0x411   :  { %v495_v50 = vsel %vm489_vm10, %v2259_v48, 0.0  ;;  %v2124_v48 = vpack.c.bf16 %v834_v47, %v832_v46 }
 0x412   :  { %v497_v51 = vmul.f32 %v495_v50, %v481_v41  ;;  %v830_v41 = vld [vmem:[#allocation8 + $0x10] sm:$0xff]  ;;  %v839_v50 = vld [vmem:[#allocation8 + $0x58] sm:$0xff] }
 0x413   :  { %v2120_v42 = vpack.c.bf16 %v830_v41, %v828_v39 }
 0x414   :  { %1931 = vmatprep.mubr.msk.f32.mxu1 %vm468_vm8, %v497_v51  ;;  %v2126_v51 = vpack.c.bf16 %v839_v50, %v837_v49 }
 0x415   :  { %1932 = vmatmul.mubr.msk.f32.vlgmr.msra.gmra.mrb[2].mxu1 %vm468_vm8, %v498_v52  ;;  %v836_v52 = vld [vmem:[#allocation8 + $0x40] sm:$0xff] }
 0x416   :  { %2113 = vmatpush3.bf16.xpose.msk.msra.mxu1 %vm2561_vm5, %v2108_v36  ;;  %1938 = vmatprep.mubr.msk.f32.mxu1 %vm384_vm4, %v581_v53  ;;  %v838_v53 = vld [vmem:[#allocation8 + $0x50] sm:$0xff] }
 0x41d   :  { %1939 = vmatmul.mubr.msk.f32.vlgmr.msra.gmra.mrb[4].mxu1 %vm384_vm4, %v583_v54  ;;  %v2128_v54 = vpack.c.bf16 %v838_v53, %v836_v52 }
 0x4e8   :  { %v2610_v56 = vpop.f32.mrb[2].mxu1 }
 0x4e9   :  { %v2612_v57 = vpop.f32.mrb[3].mxu1 }
 0x4f0   :  { %v1940_v58 = vpop.f32.mrb[4].mxu1 }
 0x4f1   :  { %v668_v61 = vadd.f32 %v1940_v58, %v2582_v19  ;;  %v662_v62 = vpop.f32.mrb[5].mxu1  ;;  %v841_v58 = vld [vmem:[#allocation8 + $0x68] sm:$0xff] }
 0x4f2   :  { %v663_v63 = vadd.f32 %v662_v62, %v2586_v20 }
 0x4f3   :  { %v674_v0 = vsel %vm468_vm8, %v668_v61, -inf }
 0x4f4   :  { %675 = vmax.xlane.f32.xlu1 %v674_v0  ;;  %v671_v1 = vsel %vm468_vm8, %v663_v63, -inf  ;;  %v842_v0 = vld [vmem:[#allocation8 + $0x70] sm:$0xff] }
 0x4f5   :  { %672 = vmax.xlane.f32.xlu0 %v671_v1 }
 0x581   :  { %v676_v2 = vpop.xlane.xlu1 %675 }
 0x582   :  { %v678_v3 = vsub.f32 %v668_v61, %v676_v2  ;;  %v673_v4 = vpop.xlane.xlu0 %672  ;;  %v843_v61 = vld [vmem:[#allocation8 + $0x78] sm:$0xff] }
 0x583   :  { %v677_v5 = vsub.f32 %v663_v63, %v673_v4  ;;  %v2130_v62 = vpack.c.bf16 %v843_v61, %v841_v58  ;;  %v840_v63 = vld [vmem:[#allocation8 + $0x60] sm:$0xff] }
 0x584   :  { %v681_v7 = vmul.f32 1.442695, %v678_v3  ;;  %v2132_v1 = vpack.c.bf16 %v842_v0, %v840_v63 }
 0x585   :  { %v679_v8 = vmul.f32 1.442695, %v677_v5 }
 0x586   :  { %2260 = vpow2.f32 %v681_v7  ;;  %v1832_v7 = vld [vmem:[%s2806_s4] ss:$0 sm:$0xff] }
 0x587   :  { %2262 = vpow2.f32 %v679_v8 }
 0x590   :  { %v2261_v10 = vpop.eup %2260 }
 0x591   :  { %v2263_v11 = vpop.eup %2262  ;;  %v684_v14 = vsel %vm113_vm6, %v2261_v10, 0.0 }
 0x592   :  { %v688_v15 = vsel %vm468_vm8, %v684_v14, 0.0  ;;  %v683_v18 = vsel %vm112_vm7, %v2263_v11, 0.0 }
 0x593   :  { %689 = vadd.xlane.f32.xlu0 %v688_v15  ;;  %v685_v21 = vsel %vm468_vm8, %v683_v18, 0.0 }
 0x597   :  { %686 = vadd.xlane.f32.xlu0 %v685_v21 }
 0x5ad   :  { %2223 = vrot.lane.b32.xlu0 %v2222_v22, %s2401_s22 }
 0x620   :  { %v690_v23 = vpop.xlane.xlu0 %689 }
 0x621   :  { %v694_v24 = vmax.f32 %v690_v23, 1e-30  ;;  %vm692_vm11 = vcmp.gt.f32.partialorder %v690_v23, 0.0 }
 0x623   :  { %2264 = vrcp.f32 %v694_v24 }
 0x624   :  { %v687_v25 = vpop.xlane.xlu0 %686 }
 0x625   :  { %v693_v26 = vmax.f32 %v687_v25, 1e-30  ;;  %vm691_vm12 = vcmp.gt.f32.partialorder %v687_v25, 0.0  ;;  %v844_v25 = vld [vmem:[%s2809_s7] sm:$0x3] }
 0x627   :  { %2266 = vrcp.f32 %v693_v26 }
 0x628   :  { %v2224_v27 = vpop.permute.xlu0 %2223 }
 0x629   :  { %v2226_v28 = vunpack.i.h.bf16 %v2224_v27  ;;  %v2225_v29 = vunpack.i.l.bf16 %v2224_v27 }
 0x62b   :  { %v2114_v30 = vpack.c.bf16 %v2226_v28, %v2225_v29 }
 0x62d   :  { %2115 = vmatprep.subr.bf16.mxu1 %v2114_v30  ;;  %v2265_v31 = vpop.eup %2264 }
 0x62e   :  { %2117 = vmatpush3.bf16.msra.mxu1 %v2114_v30  ;;  %v698_v33 = vsel %vm692_vm11, %v2265_v31, 0.0 }
 0x62f   :  { %v700_v36 = vmul.f32 %v698_v33, %v684_v14  ;;  %2119 = vmatprep.subr.bf16.mxu1 %v2118_v40  ;;  %v1833_v14 = vld [vmem:[%s2807_s5] ss:$0 sm:$0xff] }
 0x631   :  { %v2267_v32 = vpop.eup %2266 }
 0x632   :  { %v697_v34 = vsel %vm691_vm12, %v2267_v32, 0.0 }
 0x633   :  { %v699_v35 = vmul.f32 %v697_v34, %v683_v18 }
 0x635   :  { %1945 = vmatprep.mubr.msk.f32.mxu1 %vm468_vm8, %v699_v35 }
 0x636   :  { %1946 = vmatmul.mubr.msk.f32.vlgmr.msra.gmra.mrb[6].mxu1 %vm468_vm8, %v700_v36 }
 0x637   :  { %927 = vmatprep.mubr.f32.mxu1 %v2397_v55  ;;  %2121 = vmatpush1.bf16.msra.mxu1 %v2120_v42 }
 0x638   :  { %2123 = vmatprep.subr.bf16.mxu1 %v2122_v45 }
 0x63b   :  { %2125 = vmatpush1.bf16.msra.mxu1 %v2124_v48 }
 0x63c   :  { %2127 = vmatprep.subr.bf16.mxu1 %v2126_v51 }
 0x63f   :  { %2129 = vmatpush1.bf16.msra.mxu1 %v2128_v54 }
 0x640   :  { %2131 = vmatprep.subr.bf16.mxu1 %v2130_v62 }
 0x643   :  { %2133 = vmatpush1.bf16.msra.mxu1 %v2132_v1 }
 0x709   :  { %v1947_v2 = vpop.f32.mrb[6].mxu1 }
 0x70a   :  { %794 = vrot.lane.b32.xlu1 %v1947_v2, %s2400_s3  ;;  %v781_v3 = vpop.f32.mrb[7].mxu1 }
 0x70b   :  { %792 = vrot.lane.b32.xlu0 %v781_v3, %s2400_s3 }
 0x70f   :  { %800 = vrot.lane.b32.xlu0 %v2565_v13, %s2398_s0 }
 0x713   :  { %802 = vrot.lane.b32.xlu0 %v2557_v9, %s2398_s0 }
 0x77c   :  { %v795_v10 = vpop.permute.xlu1 %794 }
 0x77d   :  { %v793_v4 = vpop.permute.xlu0 %792  ;;  %v799_v13 = vsel %vm384_vm4, %v2610_v56, %v795_v10  ;;  %v849_v56 = vrot.slane %v844_v25, %v202_v60 }
 0x77e   :  { %v798_v5 = vsel %vm384_vm4, %v2612_v57, %v793_v4 }
 0x781   :  { %v801_v8 = vpop.permute.xlu0 %800 }
 0x782   :  { %v806_v11 = vadd.f32 %v801_v8, %v798_v5 }
 0x784   :  { %v815_v15 = vmul.f32 %v1832_v7, %v806_v11 }
 0x785   :  { %v803_v9 = vpop.permute.xlu0 %802 }
 0x786   :  { %v824_v18 = vadd.f32 %v1833_v14, %v815_v15  ;;  %v807_v21 = vadd.f32 %v803_v9, %v799_v13 }
 0x788   :  { %v826_v57 = vmax.f32 %v824_v18, 0.0  ;;  %v816_v22 = vmul.f32 %v1832_v7, %v807_v21 }
 0x78a   :  { %v825_v23 = vadd.f32 %v1833_v14, %v816_v22  ;;  %1834 = vmatmul.mubr.msk.f32.vlgmr.msra.gmra.mrb[8].mxu1 %vm856_vm13, %v826_v57 }
 0x78b   :  { %933 = vmatprep.mubr.f32.mxu1 %v2397_v55  ;;  %v853_v55 = vrot.slane %v844_v25, %v206_v6 }
 0x78c   :  { %v827_v24 = vmax.f32 %v825_v23, 0.0 }
 0x78e   :  { %1835 = vmatmul.mubr.msk.f32.gmra.mrb[10].mxu1 %vm856_vm13, %v827_v24 }
 0x85d   :  { %v929_v26 = vpop.f32.mrb[8].mxu1 }
 0x85e   :  { %v930_v27 = vadd.f32 %v929_v26, %v849_v56  ;;  %v931_v28 = vpop.f32.mrb[9].mxu1 }
 0x85f   :  { %v2660_v60 = vadd.f32 %v931_v28, %v853_v55 }
 0x860   :  { %1952 = vmatprep.mubr.msk.f32.mxu1 %vm384_vm4, %v930_v27 }
 0x861   :  { %v935_v29 = vpop.f32.mrb[10].mxu1 }
 0x862   :  { %v936_v30 = vadd.f32 %v935_v29, %v849_v56  ;;  %v937_v31 = vpop.f32.mrb[11].mxu1 }
 0x863   :  { %v2658_v34 = vadd.f32 %v937_v31, %v853_v55 }
 0x864   :  { %v2227_v32 = vpack.i.bf16 %v936_v30, %v930_v27 }
 0x865   :  { %v2140_v38 = vpack.c.bf16 %v2658_v34, %v2660_v60  ;;  %v2237_v25 = vpack.i.bf16 %v2658_v34, %v2660_v60 }
 0x866   :  { %2228 = vrot.lane.b32.xlu0 %v2227_v32, %s2398_s0 }
 0x8d8   :  { %v2229_v33 = vpop.permute.xlu0 %2228 }
 0x8d9   :  { %v2231_v35 = vunpack.i.h.bf16 %v2229_v33  ;;  %v2230_v36 = vunpack.i.l.bf16 %v2229_v33 }
 0x8db   :  { %v2134_v37 = vpack.c.bf16 %v2231_v35, %v2230_v36 }
 0x8dd   :  { %2136 = vmatprep.subr.msk.bf16.mxu1 %vm2561_vm5, %v2134_v37 }
 0x8de   :  { %2139 = vmatpush3.bf16.xpose.msk.msra.mxu1 %vm2561_vm5, %v2134_v37 }
 0x8df   :  { %2141 = vmatprep.subr.bf16.mxu1 %v2140_v38 }
 0x8e5   :  { %1953 = vmatmul.mubr.msk.f32.vlgmr.msra.gmra.mrb[12].mxu1 %vm384_vm4, %v936_v30 }
 0x8e6   :  { %2143 = vmatpush3.bf16.msra.mxu1 %v2140_v38 }
 0x9b8   :  { %v1954_v59 = vpop.f32.mrb[12].mxu1 }
 0x9b9   :  { %v1026_v6 = vadd.f32 %v1954_v59, %v2582_v19  ;;  %v1020_v39 = vpop.f32.mrb[13].mxu1 }
 0x9ba   :  { %v1021_v40 = vadd.f32 %v1020_v39, %v2586_v20 }
 0x9bb   :  { %v1032_v41 = vsel %vm468_vm8, %v1026_v6, -inf }
 0x9bc   :  { %1033 = vmax.xlane.f32.xlu1 %v1032_v41  ;;  %v1029_v42 = vsel %vm468_vm8, %v1021_v40, -inf }
 0x9bd   :  { %1030 = vmax.xlane.f32.xlu0 %v1029_v42 }
 0x9cd   :  { %1140 = vrot.lane.b32.xlu1 %v930_v27, %s2401_s22 }
 0x9d1   :  { %1142 = vrot.lane.b32.xlu1 %v936_v30, %s2401_s22 }
 0xa49   :  { %v1034_v43 = vpop.xlane.xlu1 %1033 }
 0xa4a   :  { %v1036_v44 = vsub.f32 %v1026_v6, %v1034_v43  ;;  %v1031_v45 = vpop.xlane.xlu0 %1030 }
 0xa4b   :  { %v1035_v46 = vsub.f32 %v1021_v40, %v1031_v45 }
 0xa4c   :  { %v1039_v47 = vmul.f32 1.442695, %v1036_v44 }
 0xa4d   :  { %v1037_v48 = vmul.f32 1.442695, %v1035_v46  ;;  %v1141_v14 = vpop.permute.xlu1 %1140 }
 0xa4e   :  { %2268 = vpow2.f32 %v1039_v47 }
 0xa4f   :  { %2270 = vpow2.f32 %v1037_v48 }
 0xa51   :  { %v1143_v15 = vpop.permute.xlu1 %1142 }
 0xa58   :  { %v2269_v49 = vpop.eup %2268 }
 0xa59   :  { %v2271_v50 = vpop.eup %2270  ;;  %v1042_v51 = vsel %vm113_vm6, %v2269_v49, 0.0  ;;  %v1388_v49 = vld [vmem:[%s2812_s10] sm:$0xff] }
 0xa5a   :  { %v1046_v52 = vsel %vm468_vm8, %v1042_v51, 0.0  ;;  %v1041_v53 = vsel %vm112_vm7, %v2271_v50, 0.0  ;;  %v1389_v50 = vld [vmem:[%s2812_s10 + $0x8] sm:$0xff] }
 0xa5b   :  { %1047 = vadd.xlane.f32.xlu0 %v1046_v52  ;;  %v1043_v54 = vsel %vm468_vm8, %v1041_v53, 0.0  ;;  %v1390_v52 = vld [vmem:[%s2812_s10 + $0x10] sm:$0xff] }
 0xa5f   :  { %1044 = vadd.xlane.f32.xlu0 %v1043_v54 }
 0xa75   :  { %2233 = vrot.lane.b32.xlu0 %v2227_v32, %s2400_s3 }
 0xae8   :  { %v1048_v58 = vpop.xlane.xlu0 %1047 }
 0xae9   :  { %v1052_v61 = vmax.f32 %v1048_v58, 1e-30  ;;  %vm1050_vm14 = vcmp.gt.f32.partialorder %v1048_v58, 0.0  ;;  %v1392_v58 = vld [vmem:[%s2812_s10 + $0x20] sm:$0xff] }
 0xaeb   :  { %2272 = vrcp.f32 %v1052_v61  ;;  %v1393_v61 = vld [vmem:[%s2812_s10 + $0x28] sm:$0xff] }
 0xaec   :  { %v1045_v62 = vpop.xlane.xlu0 %1044 }
 0xaed   :  { %v1051_v63 = vmax.f32 %v1045_v62, 1e-30  ;;  %vm1049_vm15 = vcmp.gt.f32.partialorder %v1045_v62, 0.0  ;;  %v2162_v62 = vpack.c.bf16 %v1393_v61, %v1392_v58 }
 0xaef   :  { %2274 = vrcp.f32 %v1051_v63  ;;  %v1394_v63 = vld [vmem:[%s2812_s10 + $0x30] sm:$0xff] }
 0xaf0   :  { %v2234_v0 = vpop.permute.xlu0 %2233 }
 0xaf1   :  { %v2236_v1 = vunpack.i.h.bf16 %v2234_v0  ;;  %v2235_v2 = vunpack.i.l.bf16 %v2234_v0  ;;  %v1395_v0 = vld [vmem:[%s2812_s10 + $0x38] sm:$0xff] }
 0xaf3   :  { %v2144_v3 = vpack.c.bf16 %v2236_v1, %v2235_v2  ;;  %v2166_v1 = vpack.c.bf16 %v1395_v0, %v1394_v63  ;;  %v1715_v63 = vld [vmem:[%s2816_s14 + $0x8] sm:$0xff] }
 0xaf5   :  { %2146 = vmatprep.subr.msk.bf16.mxu1 %vm2561_vm5, %v2144_v3  ;;  %v2273_v4 = vpop.eup %2272 }
 0xaf6   :  { %v1056_v7 = vsel %vm1050_vm14, %v2273_v4, 0.0 }
 0xaf7   :  { %v1058_v11 = vmul.f32 %v1056_v7, %v1042_v51  ;;  %v2154_v51 = vpack.c.bf16 %v1389_v50, %v1388_v49  ;;  %v1848_v7 = vld [vmem:[%s2810_s8] ss:$0 sm:$0xff] }
 0xaf9   :  { %v2275_v5 = vpop.eup %2274 }
 0xafa   :  { %v1055_v8 = vsel %vm1049_vm15, %v2275_v5, 0.0 }
 0xafb   :  { %v1057_v10 = vmul.f32 %v1055_v8, %v1041_v53  ;;  %v1391_v53 = vld [vmem:[%s2812_s10 + $0x18] sm:$0xff] }
 0xafc   :  { %v2158_v54 = vpack.c.bf16 %v1391_v53, %v1390_v52 }
 0xafd   :  { %1959 = vmatprep.mubr.msk.f32.mxu1 %vm468_vm8, %v1057_v10 }
 0xafe   :  { %1960 = vmatmul.mubr.msk.f32.vlgmr.msra.gmra.mrb[14].mxu1 %vm468_vm8, %v1058_v11 }
 0xaff   :  { %2149 = vmatpush3.bf16.xpose.msk.msra.mxu1 %vm2561_vm5, %v2144_v3  ;;  %1966 = vmatprep.mubr.msk.f32.mxu1 %vm384_vm4, %v1141_v14 }
 0xb06   :  { %1967 = vmatmul.mubr.msk.f32.vlgmr.msra.gmra.mrb[16].mxu1 %vm384_vm4, %v1143_v15 }
 0xbd1   :  { %v2690_v13 = vpop.f32.mrb[14].mxu1 }
 0xbd2   :  { %v2692_v9 = vpop.f32.mrb[15].mxu1 }
 0xbd9   :  { %v1968_v18 = vpop.f32.mrb[16].mxu1 }
 0xbda   :  { %v1228_v21 = vadd.f32 %v1968_v18, %v2582_v19  ;;  %v1222_v57 = vpop.f32.mrb[17].mxu1 }
 0xbdb   :  { %v1223_v22 = vadd.f32 %v1222_v57, %v2586_v20 }
 0xbdc   :  { %v1234_v23 = vsel %vm468_vm8, %v1228_v21, -inf }
 0xbdd   :  { %1235 = vmax.xlane.f32.xlu1 %v1234_v23  ;;  %v1231_v24 = vsel %vm468_vm8, %v1223_v22, -inf }
 0xbde   :  { %1232 = vmax.xlane.f32.xlu0 %v1231_v24 }
 0xbee   :  { %2238 = vrot.lane.b32.xlu1 %v2237_v25, %s2401_s22 }
 0xc6a   :  { %v1236_v56 = vpop.xlane.xlu1 %1235 }
 0xc6b   :  { %v1238_v26 = vsub.f32 %v1228_v21, %v1236_v56  ;;  %v1233_v27 = vpop.xlane.xlu0 %1232 }
 0xc6c   :  { %v1237_v28 = vsub.f32 %v1223_v22, %v1233_v27 }
 0xc6d   :  { %v1241_v29 = vmul.f32 1.442695, %v1238_v26 }
 0xc6e   :  { %v1239_v30 = vmul.f32 1.442695, %v1237_v28  ;;  %v2239_v31 = vpop.permute.xlu1 %2238 }
 0xc6f   :  { %2276 = vpow2.f32 %v1241_v29  ;;  %v2241_v32 = vunpack.i.h.bf16 %v2239_v31  ;;  %v2240_v55 = vunpack.i.l.bf16 %v2239_v31 }
 0xc70   :  { %2278 = vpow2.f32 %v1239_v30 }
 0xc71   :  { %v2150_v33 = vpack.c.bf16 %v2241_v32, %v2240_v55 }
 0xc73   :  { %2151 = vmatprep.subr.bf16.mxu1 %v2150_v33 }
 0xc74   :  { %2153 = vmatpush3.bf16.msra.mxu1 %v2150_v33 }
 0xc75   :  { %2155 = vmatprep.subr.bf16.mxu1 %v2154_v51 }
 0xc79   :  { %v2277_v35 = vpop.eup %2276 }
 0xc7a   :  { %v2279_v36 = vpop.eup %2278  ;;  %v1244_v59 = vsel %vm113_vm6, %v2277_v35, 0.0 }
 0xc7b   :  { %v1243_v37 = vsel %vm112_vm7, %v2279_v36, 0.0  ;;  %v1248_v6 = vsel %vm468_vm8, %v1244_v59, 0.0 }
 0xc7c   :  { %v1245_v38 = vsel %vm468_vm8, %v1243_v37, 0.0 }
 0xc7d   :  { %1246 = vadd.xlane.f32.xlu0 %v1245_v38 }
 0xc81   :  { %1249 = vadd.xlane.f32.xlu0 %v1248_v6 }
 0xd0a   :  { %v1247_v39 = vpop.xlane.xlu0 %1246 }
 0xd0b   :  { %v1253_v40 = vmax.f32 %v1247_v39, 1e-30  ;;  %vm1251_vm0 = vcmp.gt.f32.partialorder %v1247_v39, 0.0 }
 0xd0d   :  { %2280 = vrcp.f32 %v1253_v40 }
 0xd0e   :  { %v1250_v41 = vpop.xlane.xlu0 %1249 }
 0xd0f   :  { %v1254_v42 = vmax.f32 %v1250_v41, 1e-30  ;;  %vm1252_vm1 = vcmp.gt.f32.partialorder %v1250_v41, 0.0 }
 0xd11   :  { %2282 = vrcp.f32 %v1254_v42 }
 0xd17   :  { %v2281_v43 = vpop.eup %2280 }
 0xd18   :  { %v1257_v44 = vsel %vm1251_vm0, %v2281_v43, 0.0 }
 0xd19   :  { %v1259_v45 = vmul.f32 %v1257_v44, %v1243_v37 }
 0xd1b   :  { %v2283_v46 = vpop.eup %2282  ;;  %1973 = vmatprep.mubr.msk.f32.mxu1 %vm468_vm8, %v1259_v45 }
 0xd1c   :  { %v1258_v47 = vsel %vm1252_vm1, %v2283_v46, 0.0 }
 0xd1d   :  { %v1260_v48 = vmul.f32 %v1258_v47, %v1244_v59 }
 0xd1f   :  { %1974 = vmatmul.mubr.msk.f32.vlgmr.msra.gmra.mrb[18].mxu1 %vm468_vm8, %v1260_v48 }
 0xd20   :  { %2157 = vmatpush3.bf16.msra.mxu1 %v2154_v51 }
 0xd21   :  { %2159 = vmatprep.subr.bf16.mxu1 %v2158_v54 }
 0xd24   :  { %2161 = vmatpush3.bf16.msra.mxu1 %v2158_v54 }
 0xd25   :  { %2163 = vmatprep.subr.bf16.mxu1 %v2162_v62 }
 0xd28   :  { %2165 = vmatpush3.bf16.msra.mxu1 %v2162_v62  ;;  %v1714_v62 = vld [vmem:[%s2816_s14] sm:$0xff] }
 0xd29   :  { %2167 = vmatprep.subr.bf16.mxu1 %v2166_v1  ;;  %v2180_v0 = vpack.c.bf16 %v1715_v63, %v1714_v62 }
 0xd2c   :  { %2169 = vmatpush3.bf16.msra.mxu1 %v2166_v1  ;;  %v1716_v1 = vld [vmem:[%s2816_s14 + $0x10] sm:$0xff] }
 0xdf2   :  { %v1975_v2 = vpop.f32.mrb[18].mxu1 }
 0xdf3   :  { %1354 = vrot.lane.b32.xlu1 %v1975_v2, %s2400_s3  ;;  %v1341_v3 = vpop.f32.mrb[19].mxu1  ;;  %v1717_v2 = vld [vmem:[%s2816_s14 + $0x18] sm:$0xff] }
 0xdf4   :  { %1352 = vrot.lane.b32.xlu0 %v1341_v3, %s2400_s3  ;;  %v2184_v3 = vpack.c.bf16 %v1717_v2, %v1716_v1 }
 0xdf7   :  { %1360 = vrot.lane.b32.xlu1 %v2660_v60, %s2398_s0  ;;  %v1849_v60 = vld [vmem:[%s2811_s9] ss:$0 sm:$0xff] }
 0xdf8   :  { %1362 = vrot.lane.b32.xlu0 %v2658_v34, %s2398_s0 }
 0xe65   :  { %v1355_v4 = vpop.permute.xlu1 %1354 }
 0xe66   :  { %v1353_v5 = vpop.permute.xlu0 %1352  ;;  %v1359_v14 = vsel %vm384_vm4, %v2690_v13, %v1355_v4  ;;  %v1850_v13 = vld [vmem:[%s2813_s11] ss:$0 sm:$0xff] }
 0xe67   :  { %v1358_v10 = vsel %vm384_vm4, %v2692_v9, %v1353_v5 }
 0xe69   :  { %v1361_v8 = vpop.permute.xlu1 %1360 }
 0xe6a   :  { %v1366_v11 = vadd.f32 %v1361_v8, %v1358_v10  ;;  %v1363_v15 = vpop.permute.xlu0 %1362 }
 0xe6b   :  { %v1367_v34 = vadd.f32 %v1363_v15, %v1359_v14 }
 0xe6c   :  { %v1375_v18 = vmul.f32 %v1848_v7, %v1366_v11 }
 0xe6d   :  { %v1376_v21 = vmul.f32 %v1848_v7, %v1367_v34  ;;  %v1859_v7 = vld [vmem:[%s2814_s12] ss:$0 sm:$0xff] }
 0xe6e   :  { %v1384_v57 = vadd.f32 %v1849_v60, %v1375_v18 }
 0xe6f   :  { %v1385_v22 = vadd.f32 %v1849_v60, %v1376_v21  ;;  %v1860_v60 = vld [vmem:[%s2815_s13] ss:$0 sm:$0xff] }
 0xe70   :  { %v1386_v23 = vmax.f32 %v1384_v57, 0.0  ;;  %v1861_v57 = vld [vmem:[#allocation2] ss:$0 sm:$0xff] }
 0xe71   :  { %v1387_v24 = vmax.f32 %v1385_v22, 0.0 }
 0xe72   :  { %1992 = vmatprep.mubr.msk.f32.mxu1 %vm856_vm13, %v1386_v23 }
 0xe73   :  { %1993 = vmatmul.mubr.msk.f32.vlgmr.msra.gmra.mrb[20].mxu1 %vm856_vm13, %v1387_v24 }
 0xf46   :  { %v1994_v9 = vpop.f32.mrb[20].mxu1 }
 0xf47   :  { %v1481_v25 = vadd.f32 %v1994_v9, %v1850_v13  ;;  %v1475_v56 = vpop.f32.mrb[21].mxu1 }
 0xf48   :  { %v1476_v26 = vadd.f32 %v1850_v13, %v1475_v56 }
 0xf4a   :  { %1999 = vmatprep.mubr.msk.f32.mxu0 %vm384_vm4, %v1476_v26  ;;  %v2242_v27 = vpack.i.bf16 %v1481_v25, %v1476_v26 }
 0xf4c   :  { %2243 = vrot.lane.b32.xlu1 %v2242_v27, %s2401_s22 }
 0xfbe   :  { %v2244_v28 = vpop.permute.xlu1 %2243 }
 0xfbf   :  { %v2246_v29 = vunpack.i.h.bf16 %v2244_v28  ;;  %v2245_v30 = vunpack.i.l.bf16 %v2244_v28 }
 0xfc1   :  { %v2170_v31 = vpack.c.bf16 %v2246_v29, %v2245_v30 }
 0xfc3   :  { %2172 = vmatprep.subr.msk.bf16.mxu0 %vm2561_vm5, %v2170_v31 }
 0xfc4   :  { %2175 = vmatpush3.bf16.xpose.msk.msra.mxu0 %vm2561_vm5, %v2170_v31  ;;  %vm1806_vm5 = vcmask 7168  }
 0xfc5   :  { %2181 = vmatprep.subr.bf16.mxu0 %v2180_v0 }
 0xfcb   :  { %2000 = vmatmul.mubr.msk.f32.vlgmr.msra.gmra.mrb[4].mxu0 %vm384_vm4, %v1481_v25 }
 0xfcc   :  { %2183 = vmatpush3.bf16.msra.mxu0 %v2180_v0 }
 0xfcd   :  { %2185 = vmatprep.subr.bf16.mxu0 %v2184_v3 }
 0xfd0   :  { %2187 = vmatpush3.bf16.msra.mxu0 %v2184_v3 }
0x109e   :  { %v2001_v32 = vpop.f32.mrb[4].mxu0 }
0x109f   :  { %v1570_v55 = vadd.f32 %v2001_v32, %v2582_v19  ;;  %v1564_v33 = vpop.f32.mrb[5].mxu0 }
0x10a0   :  { %v1565_v35 = vadd.f32 %v1564_v33, %v2586_v20 }
0x10a1   :  { %v1576_v36 = vsel %vm468_vm8, %v1570_v55, -inf }
0x10a2   :  { %1577 = vmax.xlane.f32.xlu1 %v1576_v36  ;;  %v1573_v37 = vsel %vm468_vm8, %v1565_v35, -inf }
0x10a3   :  { %1574 = vmax.xlane.f32.xlu0 %v1573_v37 }
0x10b3   :  { %2248 = vrot.lane.b32.xlu1 %v2242_v27, %s2398_s0 }
0x10b7   :  { %1611 = vrot.lane.b32.xlu1 %v1481_v25, %s2400_s3 }
0x112f   :  { %v1578_v12 = vpop.xlane.xlu1 %1577 }
0x1130   :  { %v1580_v38 = vsub.f32 %v1570_v55, %v1578_v12  ;;  %v1575_v59 = vpop.xlane.xlu0 %1574 }
0x1131   :  { %v1579_v6 = vsub.f32 %v1565_v35, %v1575_v59 }
0x1132   :  { %v1583_v39 = vmul.f32 1.442695, %v1580_v38 }
0x1133   :  { %v1581_v40 = vmul.f32 1.442695, %v1579_v6  ;;  %v2249_v19 = vpop.permute.xlu1 %2248 }
0x1134   :  { %2284 = vpow2.f32 %v1583_v39  ;;  %v2251_v41 = vunpack.i.h.bf16 %v2249_v19  ;;  %v2250_v20 = vunpack.i.l.bf16 %v2249_v19 }
0x1135   :  { %2286 = vpow2.f32 %v1581_v40 }
0x1136   :  { %v2176_v42 = vpack.c.bf16 %v2251_v41, %v2250_v20 }
0x1137   :  { %v1612_v4 = vpop.permute.xlu1 %1611 }
0x1138   :  { %2177 = vmatprep.subr.bf16.mxu1 %v2176_v42 }
0x1139   :  { %2179 = vmatpush3.bf16.msra.mxu1 %v2176_v42 }
0x113e   :  { %v2285_v43 = vpop.eup %2284 }
0x113f   :  { %v2287_v44 = vpop.eup %2286  ;;  %v1586_v47 = vsel %vm113_vm6, %v2285_v43, 0.0 }
0x1140   :  { %v1585_v45 = vsel %vm112_vm7, %v2287_v44, 0.0  ;;  %v1590_v48 = vsel %vm468_vm8, %v1586_v47, 0.0 }
0x1141   :  { %v1587_v46 = vsel %vm468_vm8, %v1585_v45, 0.0 }
0x1142   :  { %1588 = vadd.xlane.f32.xlu0 %v1587_v46 }
0x1146   :  { %1591 = vadd.xlane.f32.xlu0 %v1590_v48 }
0x115c   :  { %1609 = vrot.lane.b32.xlu0 %v1476_v26, %s2400_s3 }
0x11cf   :  { %v1589_v49 = vpop.xlane.xlu0 %1588 }
0x11d0   :  { %v1595_v50 = vmax.f32 %v1589_v49, 1e-30  ;;  %vm1593_vm2 = vcmp.gt.f32.partialorder %v1589_v49, 0.0 }
0x11d2   :  { %2288 = vrcp.f32 %v1595_v50 }
0x11d3   :  { %v1592_v51 = vpop.xlane.xlu0 %1591 }
0x11d4   :  { %v1596_v52 = vmax.f32 %v1592_v51, 1e-30  ;;  %vm1594_vm3 = vcmp.gt.f32.partialorder %v1592_v51, 0.0 }
0x11d6   :  { %2290 = vrcp.f32 %v1596_v52 }
0x11d7   :  { %v1610_v8 = vpop.permute.xlu0 %1609 }
0x11dc   :  { %v2289_v53 = vpop.eup %2288 }
0x11dd   :  { %v1599_v17 = vsel %vm1593_vm2, %v2289_v53, 0.0 }
0x11de   :  { %v1601_v54 = vmul.f32 %v1599_v17, %v1585_v45 }
0x11e0   :  { %v2291_v58 = vpop.eup %2290  ;;  %2006 = vmatprep.mubr.msk.f32.mxu1 %vm468_vm8, %v1601_v54 }
0x11e1   :  { %v1600_v16 = vsel %vm1594_vm3, %v2291_v58, 0.0 }
0x11e2   :  { %v1602_v61 = vmul.f32 %v1600_v16, %v1586_v47 }
0x11e4   :  { %2007 = vmatmul.mubr.msk.f32.vlgmr.msra.gmra.mrb[22].mxu1 %vm468_vm8, %v1602_v61 }
0x12b7   :  { %v2008_v5 = vpop.f32.mrb[22].mxu1 }
0x12b8   :  { %v1693_v10 = vadd.f32 %v2008_v5, %v1612_v4  ;;  %v1687_v11 = vpop.f32.mrb[23].mxu1 }
0x12b9   :  { %v1688_v14 = vadd.f32 %v1687_v11, %v1610_v8 }
0x12ba   :  { %v1704_v15 = vmul.f32 %v1859_v7, %v1693_v10 }
0x12bb   :  { %v1703_v34 = vmul.f32 %v1859_v7, %v1688_v14 }
0x12bc   :  { %v1713_v21 = vadd.f32 %v1860_v60, %v1704_v15 }
0x12bd   :  { %v1712_v18 = vadd.f32 %v1860_v60, %v1703_v34 }
0x12bf   :  { %2017 = vmatprep.mubr.msk.f32.mxu0 %vm384_vm4, %v1712_v18 }
0x12c0   :  { %2018 = vmatmul.mubr.msk.f32.vlgmr.msra.gmra.mrb[6].mxu0 %vm384_vm4, %v1713_v21 }
0x1393   :  { %v2019_v22 = vpop.f32.mrb[6].mxu0 }
0x1394   :  { %v1803_v23 = vadd.f32 %v2019_v22, %v1861_v57  ;;  %v1797_v24 = vpop.f32.mrb[7].mxu0 }
0x1395   :  { %v1798_v13 = vadd.f32 %v1861_v57, %v1797_v24 }
0x1396   :  { %1808 = vst.msk [vmem:[%s2818_s16 + $0x8] sm:$0xff] %vm1806_vm5, %v1803_v23 }
0x1397   :  { %1807 = vst.msk [vmem:[%s2818_s16] sm:$0xff] %vm1806_vm5, %v1798_v13 }
0x1398   :  { %1813 = vsyncpa [#allocation4], 1 }
0x1399   :  { %1814 = vsyncpa [#allocation6], 1 }
0x139a   :  { %1815 = vsyncpa [#allocation9], 1 }

</bundles_post_ra>
